<compile_context>
chip_gen: v6e
topology: v6e:2x2x1
jax: 0.10.0
libtpu: 0.0.40
codegen_flags: <defaults>
</compile_context>

<pallas_src>
import functools

import numpy as np
import jax
import jax.numpy as jnp
from jax.experimental import pallas as pl
from jax.experimental.pallas import tpu as pltpu


def _cdiv(a, b):
    return (a + b - 1) // b


def _round_up(a, m):
    return _cdiv(a, m) * m


def _reduce_pixels(a):
    """Sum a (C, *pixel_dims) array over all pixel dims -> (C, 1)."""
    while a.ndim > 2:
        a = jnp.sum(a, axis=-1)
    return jnp.sum(a, axis=-1, keepdims=True)


def _seg_loss_kernel(x_ref, y_ref, acc_ref, *, valid_extent, tiles_per_shard,
                     needs_mask):
    """One grid point (b, p, t); t is the accumulation axis.

    Packed layout (N % 128 == 0):
      x_ref: (1, C, S, 128) logits, y_ref: (1, 1, S, 128) labels,
      valid_extent = number of valid 128-pixel rows (N // 128).
    Flat layout (ragged N):
      x_ref: (1, C, TN) logits, y_ref: (1, 1, TN) labels,
      valid_extent = number of valid pixels (N).
    acc_ref: (1, 1, C, 4) accumulator, columns =
      [dice intersect, sum softmax, sum onehot, CE partial sum (broadcast)].
    """
    t = pl.program_id(2)

    @pl.when(t == 0)
    def _init():
        acc_ref[...] = jnp.zeros_like(acc_ref)

    logits = x_ref[0].astype(jnp.float32)          # (C, S, 128) | (C, TN)
    labels = y_ref[0].astype(jnp.int32)            # (1, S, 128) | (1, TN)
    num_classes = logits.shape[0]

    valid = None
    if needs_mask:
        blk = pl.program_id(1) * tiles_per_shard + t   # logical block index
        span = logits.shape[1]
        if logits.ndim == 3:     # packed: mask whole 128-pixel rows (sublanes)
            idx = jax.lax.broadcasted_iota(jnp.int32, logits.shape[1:], 0)
        else:                    # flat: mask lanes
            idx = jax.lax.broadcasted_iota(jnp.int32, (1, span), 1)
        valid = (blk * span + idx) < valid_extent
        if valid.ndim == logits.ndim - 1:
            valid = valid[None]
        vf = valid.astype(jnp.float32)
        # Tail blocks contain undefined data; force it finite before exp/max.
        logits = jnp.where(valid, logits, 0.0)

    # Numerically stable softmax over the class axis (cross-vreg VPU max/add
    # in the packed layout; sublane reduce only in the flat fallback).
    m = jnp.max(logits, axis=0, keepdims=True)
    e = jnp.exp(logits - m)
    s = jnp.sum(e, axis=0, keepdims=True)
    p = e * pl.reciprocal(s, approx=False)
    lse = m + jnp.log(s)                           # per-pixel logsumexp

    # One-hot membership kept as a bool predicate (no float one-hot).
    cid = jax.lax.broadcasted_iota(jnp.int32, logits.shape, 0)
    eq = cid == labels

    if needs_mask:
        p = p * vf
        lse = lse * vf
        eq = jnp.logical_and(eq, valid)            # garbage labels -> no class

    inter_c = _reduce_pixels(jnp.where(eq, p, 0.0))        # (C, 1)
    pred_c = _reduce_pixels(p)                             # (C, 1)
    gt_c = _reduce_pixels(jnp.where(eq, 1.0, 0.0))         # (C, 1)

    # CE partial sum: sum_n [logsumexp(x_n) - x_n[y_n]] with one full reduce.
    picked = jnp.sum(jnp.where(eq, logits, 0.0), axis=0, keepdims=True)
    ce = jnp.sum(lse - picked)

    # Single consolidated accumulator update: one (C, 4) block per step.
    col = jax.lax.broadcasted_iota(jnp.int32, (num_classes, 4), 1)
    upd = (jnp.where(col == 0, inter_c, 0.0)
           + jnp.where(col == 1, pred_c, 0.0)
           + jnp.where(col == 2, gt_c, 0.0)
           + jnp.where(col == 3, ce, 0.0))
    acc_ref[...] = acc_ref[...] + upd[None, None]


def _choose_packed_tiling(n_rows, num_classes, batch):
    """Rows (of 128 pixels) per block, shards P, tiles/shard T, total blocks."""
    budget = 8 * 1024 * 1024                       # conservative live-VMEM cap
    bytes_per_row = (10 * num_classes + 8) * 128 * 4
    s_cap = max(8, min(1024, (budget // bytes_per_row) // 8 * 8))
    if batch == 1 and n_rows >= 16:
        # split spatially so both TensorCores get work even at batch 1
        s = min(s_cap, max(8, (n_rows // 2) // 8 * 8))
    elif n_rows <= s_cap:
        s = n_rows                                  # whole scale, one block
    else:
        s = s_cap
    nblk = _cdiv(n_rows, s)
    p = 2 if (batch == 1 and nblk >= 2) else 1
    t = _cdiv(nblk, p)
    return s, p, t, nblk


def _choose_flat_tiling(n_pixels, num_classes, batch):
    """Lane tile (multiple of 128, never < 512 unless it covers all of N)."""
    budget = 8 * 1024 * 1024
    bytes_per_pixel = (10 * num_classes + 8) * 4
    cap = max(512, min(4096, (budget // bytes_per_pixel) // 128 * 128))
    n128 = _round_up(n_pixels, 128)
    if batch == 1 and n128 >= 2 * 512:
        tn = min(cap, max(512, (n128 // 2) // 128 * 128))
    else:
        tn = min(cap, n128)
    nblk = _cdiv(n_pixels, tn)
    p = 2 if (batch == 1 and nblk >= 2) else 1
    t = _cdiv(nblk, p)
    return tn, p, t, nblk


def _scale_partial_sums(logits, target):
    """Run the Pallas kernel for one deep-supervision scale.

    Returns (acc, N) with acc of shape (B, P, C, 4):
      acc[..., 0] intersect, acc[..., 1] sum softmax, acc[..., 2] sum onehot,
      acc[..., 3] CE partial sum (identical across the class rows).
    """
    B, C = logits.shape[0], logits.shape[1]
    N = int(np.prod(logits.shape[2:]))
    x = logits.reshape(B, C, N)                  # native dtype, cast in kernel
    y = target.reshape(B, 1, N)                  # native dtype, cast in kernel

    if N % 128 == 0:
        # Sublane-packed layout: pixels fill both sublanes and lanes.
        Nb = N // 128
        S, P, T, nblk = _choose_packed_tiling(Nb, C, B)
        needs_mask = (P * T * S) != Nb
        x_in = x.reshape(B, C, Nb, 128)          # free (contiguous) reshape
        y_in = y.reshape(B, 1, Nb, 128)
        x_spec = pl.BlockSpec(
            (1, C, S, 128),
            lambda b, p, t: (b, 0, jnp.minimum(p * T + t, nblk - 1), 0))
        y_spec = pl.BlockSpec(
            (1, 1, S, 128),
            lambda b, p, t: (b, 0, jnp.minimum(p * T + t, nblk - 1), 0))
        valid_extent = Nb
    else:
        # Ragged N: flat lane layout, cdiv grid + in-kernel mask, no jnp.pad.
        TN, P, T, nblk = _choose_flat_tiling(N, C, B)
        needs_mask = (P * T * TN) != N
        x_in, y_in = x, y
        x_spec = pl.BlockSpec(
            (1, C, TN),
            lambda b, p, t: (b, 0, jnp.minimum(p * T + t, nblk - 1)))
        y_spec = pl.BlockSpec(
            (1, 1, TN),
            lambda b, p, t: (b, 0, jnp.minimum(p * T + t, nblk - 1)))
        valid_extent = N

    kernel = functools.partial(_seg_loss_kernel, valid_extent=valid_extent,
                               tiles_per_shard=T, needs_mask=needs_mask)

    acc = pl.pallas_call(
        kernel,
        out_shape=jax.ShapeDtypeStruct((B, P, C, 4), jnp.float32),
        grid_spec=pltpu.PrefetchScalarGridSpec(
            num_scalar_prefetch=0,
            grid=(B, P, T),
            in_specs=[x_spec, y_spec],
            out_specs=pl.BlockSpec((1, 1, C, 4), lambda b, p, t: (b, p, 0, 0)),
        ),
        compiler_params=pltpu.CompilerParams(
            dimension_semantics=("parallel", "parallel", "arbitrary"),
            vmem_limit_bytes=32 * 1024 * 1024),
    )(x_in, y_in)
    return acc, N


def dc_and_ce_loss(logits, target, smooth=1e-5):
    """DC_and_CE_loss: weight_ce=1, weight_dice=1, batch_dice=False, do_bg=False."""
    B = logits.shape[0]
    acc, N = _scale_partial_sums(logits, target)
    acc = jnp.sum(acc, axis=1)                 # (B, C, 4): reduce spatial shards
    inter = acc[:, :, 0]
    pred = acc[:, :, 1]
    gt = acc[:, :, 2]
    ce_sum = jnp.sum(acc[:, 0, 3])

    # RobustCrossEntropyLoss: mean over all B*N pixels
    ce_loss = ce_sum / (B * N)

    # MemoryEfficientSoftDiceLoss with do_bg=False -> drop class 0
    i_fg = inter[:, 1:]
    p_fg = pred[:, 1:]
    g_fg = gt[:, 1:]
    dc = (2.0 * i_fg + smooth) / jnp.maximum(g_fg + p_fg + smooth, 1e-8)
    dice_loss = -jnp.mean(dc)

    return ce_loss + dice_loss


def make_ds_weights(num_scales):
    w = np.array([1.0 / 2 ** i for i in range(num_scales)])
    w[-1] = 0.0
    w = w / w.sum()
    return w


def seg_loss(segm):
    """SegLoss.forward: segm = (list_of_logits, list_of_targets)."""
    net_outputs, targets = segm
    weights = make_ds_weights(len(net_outputs))
    total = jnp.float32(0.0)
    for w, x, y in zip(weights, net_outputs, targets):
        if float(w) == 0.0:
            continue          # zero-weight scale: skip the kernel launch
        total = total + jnp.float32(w) * dc_and_ce_loss(x, y)
    return total


# ---------------- pure-JAX reference (for verification) ----------------
def _ref_dc_and_ce(logits, target, smooth=1e-5):
    B, C = logits.shape[0], logits.shape[1]
    logp = jax.nn.log_softmax(logits.astype(jnp.float32), axis=1)
    p = jnp.exp(logp)
    onehot = jax.nn.one_hot(target[:, 0], C, axis=1, dtype=jnp.float32)
    ce = -jnp.mean(jnp.sum(onehot * logp, axis=1))
    x = p[:, 1:]
    yh = onehot[:, 1:]
    axes = tuple(range(2, logits.ndim))
    I = jnp.sum(x * yh, axis=axes)
    P = jnp.sum(x, axis=axes)
    G = jnp.sum(yh, axis=axes)
    dc = (2 * I + smooth) / jnp.maximum(G + P + smooth, 1e-8)
    return ce - jnp.mean(dc)


def _ref_seg_loss(segm):
    net_outputs, targets = segm
    weights = make_ds_weights(len(net_outputs))
    total = 0.0
    for w, x, y in zip(weights, net_outputs, targets):
        total = total + float(w) * _ref_dc_and_ce(x, y)
    return total


if __name__ == "__main__":
    key = jax.random.PRNGKey(0)

    # Case 1: B=2, 4 deep-supervision scales.  Exercises the sublane-packed
    # single-block path (96x96, 48x48), the ragged flat masked path (24x24),
    # and zero-weight scale skipping (12x12).
    B, C = 2, 4
    spatials = [(96, 96), (48, 48), (24, 24), (12, 12)]
    outs, tgts = [], []
    for (H, W) in spatials:
        key, k1, k2 = jax.random.split(key, 3)
        outs.append(jax.random.normal(k1, (B, C, H, W), jnp.float32))
        tgts.append(jax.random.randint(k2, (B, 1, H, W), 0, C, jnp.int32))
    segm = (outs, tgts)
    loss = jax.block_until_ready(seg_loss(segm))
    ref = jax.block_until_ready(_ref_seg_loss(segm))
    np.testing.assert_allclose(np.asarray(loss), np.asarray(ref),
                               rtol=1e-4, atol=1e-5)

    # Case 2: B=1.  Exercises 2-way spatial sharding, block-index clamping and
    # sublane-row masking of the packed path, plus the B=1 ragged flat path.
    B2, C2 = 1, 4
    spatials2 = [(72, 32), (36, 16), (18, 8)]
    outs2, tgts2 = [], []
    for (H, W) in spatials2:
        key, k1, k2 = jax.random.split(key, 3)
        outs2.append(jax.random.normal(k1, (B2, C2, H, W), jnp.float32))
        tgts2.append(jax.random.randint(k2, (B2, 1, H, W), 0, C2, jnp.int32))
    segm2 = (outs2, tgts2)
    loss2 = jax.block_until_ready(seg_loss(segm2))
    ref2 = jax.block_until_ready(_ref_seg_loss(segm2))
    np.testing.assert_allclose(np.asarray(loss2), np.asarray(ref2),
                               rtol=1e-4, atol=1e-5)

    print("KERNEL_OK")
</pallas_src>

<mosaic_0001>
module attributes {stable_mosaic.version = 11 : i64} {
  func.func @_seg_loss_kernel(%arg0: i32, %arg1: i32, %arg2: i32, %arg3: memref<1x4x72x128xf32, #tpu.memory_space<vmem>>, %arg4: memref<1x1x72x128xi32, #tpu.memory_space<vmem>>, %arg5: memref<1x1x4x4xf32, #tpu.memory_space<vmem>>) attributes {dimension_semantics = [#tpu.dimension_semantics<parallel>, #tpu.dimension_semantics<parallel>, #tpu.dimension_semantics<arbitrary>], iteration_bounds = array<i64: 2, 1, 1>, scalar_prefetch = 0 : i64, scratch_operands = 0 : i64, tpu.core_type = #tpu.core_type<tc>, window_params = [{transform_indices = @transform_0, window_bounds = array<i64: 1, 4, 72, 128>}, {transform_indices = @transform_1, window_bounds = array<i64: 1, 1, 72, 128>}, {transform_indices = @transform_2, window_bounds = array<i64: 1, 1, 4, 4>}]} {
    %c0_i32 = arith.constant 0 : i32
    %0 = arith.cmpi eq, %arg2, %c0_i32 : i32
    %1 = arith.extui %0 : i1 to i32
    %c0_i32_0 = arith.constant 0 : i32
    %2 = arith.cmpi ne, %1, %c0_i32_0 : i32
    scf.if %2 {
      %cst_34 = arith.constant 0.000000e+00 : f32
      %76 = vector.broadcast %cst_34 : f32 to vector<1x1x4x4xf32>
      %c0_35 = arith.constant 0 : index
      %c0_36 = arith.constant 0 : index
      %c0_37 = arith.constant 0 : index
      %c0_38 = arith.constant 0 : index
      %77 = vector.load %arg5[%c0_35, %c0_36, %c0_37, %c0_38] : memref<1x1x4x4xf32, #tpu.memory_space<vmem>>, vector<1x1x4x4xf32>
      tpu.vector_store %arg5[%c0_35, %c0_36, %c0_37, %c0_38], %76 {strides = array<i32>} : memref<1x1x4x4xf32, #tpu.memory_space<vmem>>, vector<1x1x4x4xf32>,
    } else {
    }
    %c0 = arith.constant 0 : index
    %c0_1 = arith.constant 0 : index
    %c0_2 = arith.constant 0 : index
    %c0_3 = arith.constant 0 : index
    %3 = vector.load %arg3[%c0, %c0_1, %c0_2, %c0_3] : memref<1x4x72x128xf32, #tpu.memory_space<vmem>>, vector<1x4x72x128xf32>
    %4 = vector.shape_cast %3 : vector<1x4x72x128xf32> to vector<4x72x128xf32>
    %c0_4 = arith.constant 0 : index
    %c0_5 = arith.constant 0 : index
    %c0_6 = arith.constant 0 : index
    %c0_7 = arith.constant 0 : index
    %5 = vector.load %arg4[%c0_4, %c0_5, %c0_6, %c0_7] : memref<1x1x72x128xi32, #tpu.memory_space<vmem>>, vector<1x1x72x128xi32>
    %6 = vector.shape_cast %5 : vector<1x1x72x128xi32> to vector<1x72x128xi32>
    %cst = arith.constant dense<0xFF800000> : vector<72x128xf32>
    %7 = vector.multi_reduction <maximumf>, %4, %cst [0] : vector<4x72x128xf32> to vector<72x128xf32>
    %8 = vector.shape_cast %7 : vector<72x128xf32> to vector<1x72x128xf32>
    %9 = vector.broadcast %8 : vector<1x72x128xf32> to vector<4x72x128xf32>
    %10 = arith.subf %4, %9 : vector<4x72x128xf32>
    %11 = math.exp %10 : vector<4x72x128xf32>
    %cst_8 = arith.constant dense<0.000000e+00> : vector<72x128xf32>
    %12 = vector.multi_reduction <add>, %11, %cst_8 [0] : vector<4x72x128xf32> to vector<72x128xf32>
    %13 = vector.shape_cast %12 : vector<72x128xf32> to vector<1x72x128xf32>
    %14 = tpu.reciprocal %13 : vector<1x72x128xf32> -> vector<1x72x128xf32>
    %15 = vector.broadcast %14 : vector<1x72x128xf32> to vector<4x72x128xf32>
    %16 = arith.mulf %11, %15 : vector<4x72x128xf32>
    %17 = math.log %13 : vector<1x72x128xf32>
    %18 = arith.addf %8, %17 : vector<1x72x128xf32>
    %19 = tpu.iota {dimensions = array<i32: 0>} : vector<4x72x128xi32>
    %20 = vector.broadcast %6 : vector<1x72x128xi32> to vector<4x72x128xi32>
    %21 = arith.cmpi eq, %19, %20 : vector<4x72x128xi32>
    %cst_9 = arith.constant 0.000000e+00 : f32
    %22 = vector.broadcast %cst_9 : f32 to vector<4x72x128xf32>
    %23 = arith.select %21, %16, %22 : vector<4x72x128xi1>, vector<4x72x128xf32>
    %cst_10 = arith.constant dense<0.000000e+00> : vector<4x72xf32>
    %24 = vector.multi_reduction <add>, %23, %cst_10 [2] : vector<4x72x128xf32> to vector<4x72xf32>
    %cst_11 = arith.constant dense<0.000000e+00> : vector<4xf32>
    %25 = vector.multi_reduction <add>, %24, %cst_11 [1] : vector<4x72xf32> to vector<4xf32>
    %26 = vector.shape_cast %25 : vector<4xf32> to vector<4x1xf32>
    %cst_12 = arith.constant dense<0.000000e+00> : vector<4x72xf32>
    %27 = vector.multi_reduction <add>, %16, %cst_12 [2] : vector<4x72x128xf32> to vector<4x72xf32>
    %cst_13 = arith.constant dense<0.000000e+00> : vector<4xf32>
    %28 = vector.multi_reduction <add>, %27, %cst_13 [1] : vector<4x72xf32> to vector<4xf32>
    %29 = vector.shape_cast %28 : vector<4xf32> to vector<4x1xf32>
    %cst_14 = arith.constant 1.000000e+00 : f32
    %cst_15 = arith.constant 0.000000e+00 : f32
    %30 = vector.broadcast %cst_14 : f32 to vector<4x72x128xf32>
    %31 = vector.broadcast %cst_15 : f32 to vector<4x72x128xf32>
    %32 = arith.select %21, %30, %31 : vector<4x72x128xi1>, vector<4x72x128xf32>
    %cst_16 = arith.constant dense<0.000000e+00> : vector<4x72xf32>
    %33 = vector.multi_reduction <add>, %32, %cst_16 [2] : vector<4x72x128xf32> to vector<4x72xf32>
    %cst_17 = arith.constant dense<0.000000e+00> : vector<4xf32>
    %34 = vector.multi_reduction <add>, %33, %cst_17 [1] : vector<4x72xf32> to vector<4xf32>
    %35 = vector.shape_cast %34 : vector<4xf32> to vector<4x1xf32>
    %cst_18 = arith.constant 0.000000e+00 : f32
    %36 = vector.broadcast %cst_18 : f32 to vector<4x72x128xf32>
    %37 = arith.select %21, %4, %36 : vector<4x72x128xi1>, vector<4x72x128xf32>
    %cst_19 = arith.constant dense<0.000000e+00> : vector<72x128xf32>
    %38 = vector.multi_reduction <add>, %37, %cst_19 [0] : vector<4x72x128xf32> to vector<72x128xf32>
    %39 = vector.shape_cast %38 : vector<72x128xf32> to vector<1x72x128xf32>
    %40 = arith.subf %18, %39 : vector<1x72x128xf32>
    %41 = vector.shape_cast %40 : vector<1x72x128xf32> to vector<1x1x72x128xf32>
    %cst_20 = arith.constant dense<0.000000e+00> : vector<1xf32>
    %42 = vector.multi_reduction <add>, %41, %cst_20 [1, 2, 3] : vector<1x1x72x128xf32> to vector<1xf32>
    %43 = vector.shape_cast %42 : vector<1xf32> to vector<1x1x1x1xf32>
    %44 = vector.extract %43[0, 0, 0, 0] : f32 from vector<1x1x1x1xf32>
    %45 = tpu.iota {dimensions = array<i32: 1>} : vector<4x4xi32>
    %c0_i32_21 = arith.constant 0 : i32
    %46 = vector.broadcast %c0_i32_21 : i32 to vector<4x4xi32>
    %47 = arith.cmpi eq, %45, %46 : vector<4x4xi32>
    %cst_22 = arith.constant 0.000000e+00 : f32
    %48 = vector.shape_cast %26 : vector<4x1xf32> to vector<4x1xf32>
    %49 = vector.broadcast %48 : vector<4x1xf32> to vector<4x4xf32>
    %50 = vector.broadcast %cst_22 : f32 to vector<4x4xf32>
    %51 = arith.select %47, %49, %50 : vector<4x4xi1>, vector<4x4xf32>
    %c1_i32 = arith.constant 1 : i32
    %52 = vector.broadcast %c1_i32 : i32 to vector<4x4xi32>
    %53 = arith.cmpi eq, %45, %52 : vector<4x4xi32>
    %cst_23 = arith.constant 0.000000e+00 : f32
    %54 = vector.shape_cast %29 : vector<4x1xf32> to vector<4x1xf32>
    %55 = vector.broadcast %54 : vector<4x1xf32> to vector<4x4xf32>
    %56 = vector.broadcast %cst_23 : f32 to vector<4x4xf32>
    %57 = arith.select %53, %55, %56 : vector<4x4xi1>, vector<4x4xf32>
    %58 = arith.addf %51, %57 : vector<4x4xf32>
    %c2_i32 = arith.constant 2 : i32
    %59 = vector.broadcast %c2_i32 : i32 to vector<4x4xi32>
    %60 = arith.cmpi eq, %45, %59 : vector<4x4xi32>
    %cst_24 = arith.constant 0.000000e+00 : f32
    %61 = vector.shape_cast %35 : vector<4x1xf32> to vector<4x1xf32>
    %62 = vector.broadcast %61 : vector<4x1xf32> to vector<4x4xf32>
    %63 = vector.broadcast %cst_24 : f32 to vector<4x4xf32>
    %64 = arith.select %60, %62, %63 : vector<4x4xi1>, vector<4x4xf32>
    %65 = arith.addf %58, %64 : vector<4x4xf32>
    %c3_i32 = arith.constant 3 : i32
    %66 = vector.broadcast %c3_i32 : i32 to vector<4x4xi32>
    %67 = arith.cmpi eq, %45, %66 : vector<4x4xi32>
    %cst_25 = arith.constant 0.000000e+00 : f32
    %68 = vector.broadcast %44 : f32 to vector<4x4xf32>
    %69 = vector.broadcast %cst_25 : f32 to vector<4x4xf32>
    %70 = arith.select %67, %68, %69 : vector<4x4xi1>, vector<4x4xf32>
    %71 = arith.addf %65, %70 : vector<4x4xf32>
    %c0_26 = arith.constant 0 : index
    %c0_27 = arith.constant 0 : index
    %c0_28 = arith.constant 0 : index
    %c0_29 = arith.constant 0 : index
    %72 = vector.load %arg5[%c0_26, %c0_27, %c0_28, %c0_29] : memref<1x1x4x4xf32, #tpu.memory_space<vmem>>, vector<1x1x4x4xf32>
    %73 = vector.shape_cast %71 : vector<4x4xf32> to vector<1x1x4x4xf32>
    %74 = arith.addf %72, %73 : vector<1x1x4x4xf32>
    %c0_30 = arith.constant 0 : index
    %c0_31 = arith.constant 0 : index
    %c0_32 = arith.constant 0 : index
    %c0_33 = arith.constant 0 : index
    %75 = vector.load %arg5[%c0_30, %c0_31, %c0_32, %c0_33] : memref<1x1x4x4xf32, #tpu.memory_space<vmem>>, vector<1x1x4x4xf32>
    tpu.vector_store %arg5[%c0_30, %c0_31, %c0_32, %c0_33], %74 {strides = array<i32>} : memref<1x1x4x4xf32, #tpu.memory_space<vmem>>, vector<1x1x4x4xf32>,
    return
  }
  func.func @transform_0(%arg0: i32, %arg1: i32, %arg2: i32) -> (i32, i32, i32, i32) {
    %c1_i32 = arith.constant 1 : i32
    %0 = arith.muli %arg1, %c1_i32 : i32
    %1 = arith.addi %0, %arg2 : i32
    %c0_i32 = arith.constant 0 : i32
    %2 = arith.minsi %1, %c0_i32 : i32
    %c0_i32_0 = arith.constant 0 : i32
    %c0_i32_1 = arith.constant 0 : i32
    %c0_i32_2 = arith.constant 0 : i32
    return %arg0, %c0_i32_0, %2, %c0_i32_1 : i32, i32, i32, i32
  }
  func.func @transform_1(%arg0: i32, %arg1: i32, %arg2: i32) -> (i32, i32, i32, i32) {
    %c1_i32 = arith.constant 1 : i32
    %0 = arith.muli %arg1, %c1_i32 : i32
    %1 = arith.addi %0, %arg2 : i32
    %c0_i32 = arith.constant 0 : i32
    %2 = arith.minsi %1, %c0_i32 : i32
    %c0_i32_0 = arith.constant 0 : i32
    %c0_i32_1 = arith.constant 0 : i32
    %c0_i32_2 = arith.constant 0 : i32
    return %arg0, %c0_i32_0, %2, %c0_i32_1 : i32, i32, i32, i32
  }
  func.func @transform_2(%arg0: i32, %arg1: i32, %arg2: i32) -> (i32, i32, i32, i32) {
    %c0_i32 = arith.constant 0 : i32
    %c0_i32_0 = arith.constant 0 : i32
    %c0_i32_1 = arith.constant 0 : i32
    return %arg0, %arg1, %c0_i32, %c0_i32_0 : i32, i32, i32, i32
  }
}

</mosaic_0001>

<bundles_post_ra>
// kernel: tpu_custom_call.1
= control target key start
LH: loop header
LB: loop body
LE: loop exit
PB: predicated region body
PF: predicated region fallthrough
CT: control target
= control target key end

     0   :  { %7 = vsyncpa [#allocation3], 0  ;;  %s3663_s0 = inlined_call_operand.hbm [shape: f32[2,4,72,128], index: 0, kind: input, shape index: {}]   ;;  %s3664_s1 = inlined_call_operand.hbm [shape: s32[2,1,72,128], index: 1, kind: input, shape index: {}]   ;;  %s3665_s2 = inlined_call_operand.hbm [shape: f32[2,1,4,4], index: 2, kind: output, shape index: {}]  }
   0x1   :  { %9 = vsyncpa [#allocation3 + $0x1], 0 }
   0x2   :  { %10 = vsyncpa [#allocation6], 0 }
   0x3   :  { %12 = vsyncpa [#allocation6 + $0x1], 0 }
   0x4   :  { %13 = vsyncpa [#allocation4], 0 }
   0x5   :  { %15 = vsyncpa [#allocation4 + $0x1], 0  ;;  %s2137_s9 = smov 0   ;;  %s2139_s10 = smov 0  }
   0x6   :  { %s2141_s11 = smov 0   ;;  %s2143_s12 = smov 0  }
   0x7   :  { %s2145_s13 = smov 0   ;;  %s2147_s14 = smov 0  }
   0x8 LB: > { %s1776_s15 = sadd.s32 4294967295, %s2114_s14   ;;  %s1777_s16 = sadd.s32 4294967294, %s2114_s14   ;;  %s2114_s14 = sphi %s2147_s14, %s21_s14   ;;  %s2110_s13 = sphi %s2145_s13, %s3844_s13   ;;  %s2106_s12 = sphi %s2143_s12, %s3843_s12   ;;  %s2102_s11 = sphi %s2141_s11, %s3842_s11   ;;  %s2098_s10 = sphi %s2139_s10, %s3841_s10   ;;  %s2094_s9 = sphi %s2137_s9, %s3840_s9  }
   0x9   : > { %s40_s17 = sadd.s32 1, %s2110_s13  ;;  %s55_s18 = sadd.s32 1, %s2102_s11 }
   0xa   : > { %p42_p0 = scmp.ge.s32.totalorder %s40_s17, 2  ;;  %p62_p1 = scmp.ne.s32.totalorder %s2102_s11, %s2098_s10 }
   0xb   : > { %p63_p2 = scmp.eq.s32.totalorder %s2114_s14, 0  ;;  %p68_p3 = scmp.ne.s32.totalorder %s2098_s10, %s2094_s9 }
   0xc   : > { %s3846_s17 = smov (%p42_p0, %s40_s17), 0  ;;  %p69_p5 = scmp.eq.s32.totalorder %s1776_s15, 0 }
   0xd   : > { %p2178_p4 = por %p63_p2, %p62_p1  ;;  %s50_s20 = ssub.s32 %s2110_s13, %s3846_s17 }
   0xe   : > { %p128_p6 = scmp.eq.s32.totalorder %s1776_s15, 1  ;;  %p53_p7 = scmp.eq.s32.totalorder %s50_s20, 0 }
   0xf   : > { %p2184_p8 = por %p69_p5, %p68_p3  ;;  %p134_p10 = scmp.eq.s32.totalorder %s1777_s16, 1 }
  0x10   : > { %p2188_p9 = por %p128_p6, %p62_p1  ;;  %p1813_p13 = scmp.lt.s32.totalorder %s2114_s14, 2 }
  0x11   : > { %s2193_s23 = scalar_select %p53_p7, %s2102_s11, %s55_s18  }
  0x12   : > { %p2195_p11 = por %p134_p10, %p68_p3  ;;  %s2202_s25 = sand.u32 1, %s2102_s11  }
  0x13   : > { %s1788_s26 = smul.u32 288, %s2202_s25  ;;  %p2208_p0 = pnand %p1813_p13, %p2178_p4 }
  0x14   : > { %s1789_s27 = smul.u32 4608, %s2110_s13  ;;  %p1782_p1 = scmp.ge.s32.totalorder %s2114_s14, 1 }
  0x15   : > { %s158_s4 = scalar_lea.vmem [#allocation2], %s1788_s26  ;;  %s155_s6 = scalar_lea.sflag [#allocation3], %s2202_s25 }
  0x16   : > { %s169_s3 = scalar_lea.hbm %s3663_s0, %s1789_s27  ;;  %s170_s5 = sshll.u32 %s158_s4, 4  ;;  %s171_s5 = int_to_ptr.vmem [resolvable:$true] %s170_s5 }
  0x17   : > { %p1976_p2 = pneg %p2208_p0  ;;  %s1987_s7 = scalar_lea.vmem %s171_s5, 4608 }
  0x18   : > { %p1988_p3 = scmp.ne.s32.totalorder %s171_s5, %s1987_s7  ;;  %s2116_s8 = smov [#allocation2]  }
  0x19   : > { %s1992_s15 = sshll.u32 %s2116_s8, 4  ;;  %s1993_s15 = int_to_ptr.vmem [resolvable:$false] %s1992_s15 }
  0x1a   : > { %p1990_p4 = pnand %p1988_p3, %p1976_p2  ;;  %s1994_s16 = scalar_lea.vmem %s1993_s15, 9216 }
  0x1b   : > { %p1995_p6 = scmp.lt.s32.totalorder %s171_s5, %s1993_s15  ;;  %p1996_p7 = scmp.lt.s32.totalorder %s1994_s16, %s1987_s7 }
  0x1c   : > { %p1991_p5 = pneg %p1990_p4 }
  0x1d   : > { %p1997_p10 = por %p1996_p7, %p1995_p6 }
  0x1f   : > { %p1998_p13 = pnand %p1997_p10, %p1991_p5 }
  0x21   : > { %2001 = shalt.err (!%p1998_p13)
}
  0x22   : > { %s2117_s18 = smov 128   ;;  %s2118_s19 = smov 8  }
  0x23   : > { %1805 = dma.hbm_to_vmem [thread:$0]  (!%p2208_p0), %s169_s3, 4608, %s171_s5, %s155_s6, %s2117_s18, %s2117_s18, %s2118_s19  }
  0x24   : > { %p204_p3 = scmp.lt.s32.totalorder %s2114_s14, 3  ;;  %s1790_s20 = smul.u32 72, %s2202_s25 }
  0x25   : > { %s1791_s27 = smul.u32 1152, %s2110_s13  ;;  %s181_s15 = scalar_lea.sflag [#allocation6], %s2202_s25 }
  0x26   : > { %p2228_p4 = pnand %p1782_p1, %p204_p3  ;;  %s184_s7 = scalar_lea.vmem [#allocation5], %s1790_s20 }
  0x27   : > { %s195_s4 = scalar_lea.hbm %s3664_s1, %s1791_s27  ;;  %s196_s8 = sshll.u32 %s184_s7, 4  ;;  %s197_s8 = int_to_ptr.vmem [resolvable:$true] %s196_s8 }
  0x28   : > { %s2015_s16 = scalar_lea.vmem %s197_s8, 1152  ;;  %s2119_s3 = smov [#allocation5]  }
  0x29   : > { %p2016_p5 = scmp.ne.s32.totalorder %s197_s8, %s2015_s16  ;;  %s2020_s5 = sshll.u32 %s2119_s3, 4  ;;  %s2021_s5 = int_to_ptr.vmem [resolvable:$false] %s2020_s5 }
  0x2a   : > { %s2022_s6 = scalar_lea.vmem %s2021_s5, 2304  ;;  %p2023_p1 = scmp.lt.s32.totalorder %s197_s8, %s2021_s5 }
  0x2b   : > { %p2018_p6 = pnand %p2016_p5, %p1976_p2  ;;  %p2024_p10 = scmp.lt.s32.totalorder %s2022_s6, %s2015_s16 }
  0x2d   : > { %p2019_p7 = pneg %p2018_p6  ;;  %p2025_p13 = por %p2024_p10, %p2023_p1 }
  0x2f   : > { %p2026_p3 = pnand %p2025_p13, %p2019_p7 }
  0x31   : > { %2029 = shalt.err (!%p2026_p3)
}
  0x32   : > { %1808 = dma.hbm_to_vmem [thread:$0]  (!%p2208_p0), %s195_s4, 1152, %s197_s8, %s181_s15, %s2117_s18, %s2117_s18, %s2118_s19  }
  0x33   : > { %208 = sbr.rel (%p2228_p4) target bundleno = 650 (0x28a), region = 28 }
  0x38   : > { %s2245_s25 = sand.u32 1, %s2098_s10  }
  0x39   : > { %s1792_s20 = smul.u32 288, %s2245_s25  ;;  %s211_s27 = scalar_lea.sflag [#allocation3], %s2245_s25 }
  0x3b   : > { %s2249_s29 = scalar_lea.vmem [#allocation2], %s1792_s20 }
  0x3c   : > { %2081 = dma.done.wait (%p2184_p8), %s211_s27, 4608  }
  0x3d   : > { %2083 = vsyncadd (%p2184_p8), %s211_s27, 4294962688  ;;  %s1793_s28 = smul.u32 72, %s2245_s25  ;;  %s220_s18 = scalar_lea.sflag [#allocation6], %s2245_s25 }
  0x3f   : > { %s2257_s19 = scalar_lea.vmem [#allocation5], %s1793_s28 }
  0x40   : > { %2085 = dma.done.wait (%p2184_p8), %s220_s18, 1152  }
  0x41   : > { %2087 = vsyncadd (%p2184_p8), %s220_s18, 4294966144  ;;  %v265_v0 = vld [vmem:[%s2249_s29 + $0x10] sm:$0xff]  ;;  %v274_v1 = vld [vmem:[%s2249_s29 + $0x58] sm:$0xff]  ;;  %s1783_s21 = sshll.u32 %s2245_s25, 2  ;;  %s1785_s4 = sshll.u32 %s2106_s12, 6 }
  0x42   : > { %v2266_v2 = vld [vmem:[%s2249_s29 + $0xa0] sm:$0xff]  ;;  %v2269_v3 = vld [vmem:[%s2257_s19 + $0x10] sm:$0xff]  ;;  %v314_v4 = vmax.f32 %v265_v0, %v274_v1  ;;  %v2273_v6 = vld [vmem:[%s2249_s29 + $0xe8] sm:$0xff]  ;;  %s248_s26 = scalar_lea.vmem [#allocation7], %s1783_s21  ;;  %s1663_s16 = scalar_lea.hbm %s3665_s2, %s1785_s4 }
  0x43   : > { %v263_v5 = vld [vmem:[%s2249_s29] sm:$0xff]  ;;  %3731 = vst [vmem:[#allocation11_spill] sm:$0xff] %v2273_v6  ;;  %vm3695_vm0 = vcmp.eq.s32.totalorder %v2269_v3, 0  ;;  %v2277_v7 = vld [vmem:[%s2249_s29 + $0x48] sm:$0xff]  ;;  %v2280_v8 = vld [vmem:[%s2249_s29 + $0x90] sm:$0xff]  ;;  %vm3715_vm1 = vcmp.eq.s32.totalorder %v2269_v3, 1 }
  0x44   : > { %v315_v9 = vmax.f32 %v314_v4, %v2266_v2  ;;  %v1547_v10 = vsel %vm3695_vm0, %v265_v0, 0.0  ;;  %v308_v11 = vmax.f32 %v263_v5, %v2277_v7  ;;  %v2288_v12 = vld [vmem:[%s2249_s29 + $0x18] sm:$0xff]  ;;  %v2291_v13 = vld [vmem:[%s2249_s29 + $0x60] sm:$0xff]  ;;  %v1556_v14 = vsel %vm3715_vm1, %v274_v1, 0.0  ;;  %v2299_v16 = vld [vmem:[%s2249_s29 + $0xa8] sm:$0xff]  ;;  %s1665_s7 = sshll.u32 %s248_s26, 4  ;;  %s1666_s7 = int_to_ptr.vmem [resolvable:$true] %s1665_s7 }
  0x45   : > { %v2296_v15 = vld [vmem:[%s2249_s29 + $0xd8] sm:$0xff]  ;;  %v317_v17 = vmax.f32 %v2288_v12, %v2291_v13  ;;  %v2303_v18 = vadd.f32 %v1556_v14, %v1547_v10  ;;  %v2310_v21 = vld [vmem:[%s2249_s29 + $0xf0] sm:$0xff]  ;;  %v2313_v22 = vld [vmem:[%s2249_s29 + $0x8] sm:$0xff]  ;;  %s1651_s3 = scalar_lea.sflag [#allocation4], %s2245_s25  ;;  %s2030_s5 = scalar_lea.vmem %s1666_s7, 64 }
  0x46   : > { %v2306_v19 = vmax.f32 %v315_v9, %v2273_v6  ;;  %v309_v20 = vmax.f32 %v308_v11, %v2280_v8  ;;  %3733 = vst [vmem:[#allocation13_spill] sm:$0xff] %v2310_v21  ;;  %v2316_v23 = vld [vmem:[%s2249_s29 + $0x50] sm:$0xff]  ;;  %v2320_v25 = vld [vmem:[%s2249_s29 + $0x98] sm:$0xff]  ;;  %v2331_v31 = vld [vmem:[%s2257_s19] sm:$0xff]  ;;  %p2031_p8 = scmp.ne.s32.totalorder %s1666_s7, %s2030_s5  ;;  %s2121_s6 = smov [#allocation7]  }
  0x47   : > { %v318_v24 = vmax.f32 %v317_v17, %v2299_v16  ;;  %v311_v26 = vmax.f32 %v2313_v22, %v2316_v23  ;;  %v2346_v42 = vld [vmem:[%s2249_s29 + $0x28] sm:$0xff]  ;;  %v2349_v43 = vld [vmem:[%s2249_s29 + $0x70] sm:$0xff]  ;;  %v2358_v47 = vld [vmem:[%s2249_s29 + $0xe0] sm:$0xff]  ;;  %vm3697_vm2 = vcmp.eq.s32.totalorder %v2331_v31, 0  ;;  %vm551_vm3 = vcmp.eq.s32.totalorder %v2331_v31, 1  ;;  %s2034_s20 = sshll.u32 %s2121_s6, 4  ;;  %s2035_s20 = int_to_ptr.vmem [resolvable:$false] %s2034_s20 }
  0x48   : > { %3732 = vst [vmem:[#allocation12_spill] sm:$0xff] %v2306_v19  ;;  %v337_v27 = vsub.f32 %v265_v0, %v2306_v19  ;;  %v346_v28 = vsub.f32 %v274_v1, %v2306_v19  ;;  %v355_v29 = vsub.f32 %v2266_v2, %v2306_v19  ;;  %v364_v30 = vsub.f32 %v2273_v6, %v2306_v19  ;;  %v2366_v54 = vld [vmem:[%s2257_s19 + $0x18] sm:$0xff]  ;;  %v2396_v9 = vld [vmem:[%s2249_s29 + $0x68] sm:$0xff]  ;;  %p2032_p0 = pnand %p2031_p8, %p2188_p9  ;;  %s2036_s12 = scalar_lea.vmem %s2035_s20, 128 }
  0x49   : > { %v2334_v32 = vmax.f32 %v309_v20, %v2296_v15  ;;  %v2337_v33 = vmax.f32 %v318_v24, %v2310_v21  ;;  %v312_v37 = vmax.f32 %v311_v26, %v2320_v25  ;;  %3736 = vst [vmem:[#allocation16_spill] sm:$0xff] %v2358_v47  ;;  %v323_v52 = vmax.f32 %v2346_v42, %v2349_v43  ;;  %v2374_v57 = vld [vmem:[%s2249_s29 + $0xb8] sm:$0xff]  ;;  %v2388_v0 = vld [vmem:[%s2249_s29 + $0x100] sm:$0xff]  ;;  %p2037_p4 = scmp.lt.s32.totalorder %s1666_s7, %s2035_s20  ;;  %p2038_p5 = scmp.lt.s32.totalorder %s2036_s12, %s2030_s5 }
  0x4a   : > { %v375_v34 = vmul.f32 1.442695, %v337_v27  ;;  %v393_v35 = vmul.f32 1.442695, %v346_v28  ;;  %v411_v36 = vmul.f32 1.442695, %v355_v29  ;;  %p2033_p2 = pneg %p2032_p0 }
  0x4b   : > { %3734 = vst [vmem:[#allocation14_spill] sm:$0xff] %v2334_v32  ;;  %3735 = vst [vmem:[#allocation15_spill] sm:$0xff] %v2337_v33  ;;  %v429_v38 = vmul.f32 1.442695, %v364_v30  ;;  %v335_v39 = vsub.f32 %v263_v5, %v2334_v32  ;;  %v344_v40 = vsub.f32 %v2277_v7, %v2334_v32  ;;  %v353_v41 = vsub.f32 %v2280_v8, %v2334_v32  ;;  %v2391_v1 = vld [vmem:[%s2249_s29 + $0x20] sm:$0xff]  ;;  %v2399_v10 = vld [vmem:[%s2249_s29 + $0x38] sm:$0xff]  ;;  %p2039_p6 = por %p2038_p5, %p2037_p4 }
  0x4c   : > { %1866 = vpow2.f32 %v375_v34  ;;  %v362_v44 = vsub.f32 %v2296_v15, %v2334_v32  ;;  %v338_v45 = vsub.f32 %v2288_v12, %v2337_v33  ;;  %v347_v46 = vsub.f32 %v2291_v13, %v2337_v33  ;;  %3738 = vst [vmem:[#allocation18_spill] sm:$0xff] %v2388_v0  ;;  %v2402_v11 = vld [vmem:[%s2249_s29 + $0x80] sm:$0xff]  ;;  %v2415_v28 = vld [vmem:[%s2249_s29 + $0xb0] sm:$0xff]  ;;  %v2585_v6 = vld [vmem:[%s2249_s29 + $0x118] sm:$0xff] }
  0x4d   : > { %1868 = vpow2.f32 %v393_v35  ;;  %v371_v48 = vmul.f32 1.442695, %v335_v39  ;;  %v389_v49 = vmul.f32 1.442695, %v344_v40  ;;  %v407_v50 = vmul.f32 1.442695, %v353_v41  ;;  %p2040_p7 = pnand %p2039_p6, %p2033_p2 }
  0x4e   : > { %1870 = vpow2.f32 %v411_v36  ;;  %v356_v51 = vsub.f32 %v2299_v16, %v2337_v33  ;;  %v425_v53 = vmul.f32 1.442695, %v362_v44  ;;  %v365_v55 = vsub.f32 %v2310_v21, %v2337_v33  ;;  %v2418_v29 = vld [vmem:[%s2257_s19 + $0x8] sm:$0xff]  ;;  %3753 = vst [vmem:[#allocation33_spill] sm:$0xff] %v2585_v6 }
  0x4f   : > { %1872 = vpow2.f32 %v429_v38  ;;  %v2371_v56 = vmax.f32 %v312_v37, %v2358_v47  ;;  %v2379_v58 = vsel %vm3697_vm2, %v263_v5, 0.0  ;;  %v377_v59 = vmul.f32 1.442695, %v338_v45  ;;  %v2431_v38 = vld [vmem:[%s2249_s29 + $0xf8] sm:$0xff]  ;;  %v2434_v39 = vld [vmem:[%s2249_s29 + $0xc8] sm:$0xff] }
  0x50   : > { %1874 = vpow2.f32 %v371_v48  ;;  %v395_v60 = vmul.f32 1.442695, %v347_v46  ;;  %v413_v4 = vmul.f32 1.442695, %v356_v51  ;;  %vm3701_vm4 = vcmp.eq.s32.totalorder %v2366_v54, 0  ;;  %3740 = vst [vmem:[#allocation20_spill] sm:$0xff] %v2431_v38 }
  0x51   : > { %3737 = vst [vmem:[#allocation17_spill] sm:$0xff] %v2371_v56  ;;  %1876 = vpow2.f32 %v389_v49  ;;  %v336_v61 = vsub.f32 %v2313_v22, %v2371_v56  ;;  %v345_v62 = vsub.f32 %v2316_v23, %v2371_v56  ;;  %v354_v63 = vsub.f32 %v2320_v25, %v2371_v56  ;;  %v2451_v51 = vld [vmem:[%s2249_s29 + $0x110] sm:$0xff] }
  0x52   : > { %1878 = vpow2.f32 %v407_v50  ;;  %v324_v5 = vmax.f32 %v323_v52, %v2374_v57  ;;  %v431_v14 = vmul.f32 1.442695, %v365_v55  ;;  %v2407_v17 = vsel %vm3701_vm4, %v2288_v12, 0.0  ;;  %3742 = vst [vmem:[#allocation22_spill] sm:$0xff] %v2451_v51 }
  0x53   : > { %1880 = vpow2.f32 %v425_v53  ;;  %v363_v20 = vsub.f32 %v2358_v47, %v2371_v56  ;;  %v373_v24 = vmul.f32 1.442695, %v336_v61  ;;  %v391_v26 = vmul.f32 1.442695, %v345_v62  ;;  %v2534_v56 = vld [vmem:[%s2249_s29 + $0x40] sm:$0xff] }
  0x54   : > { %1882 = vpow2.f32 %v377_v59  ;;  %v2412_v27 = vmax.f32 %v324_v5, %v2388_v0  ;;  %v409_v30 = vmul.f32 1.442695, %v354_v63  ;;  %v320_v12 = vmax.f32 %v2391_v1, %v2396_v9 }
  0x55   : > { %1884 = vpow2.f32 %v395_v60  ;;  %v329_v34 = vmax.f32 %v2399_v10, %v2402_v11  ;;  %v427_v40 = vmul.f32 1.442695, %v363_v20  ;;  %vm3703_vm5 = vcmp.eq.s32.totalorder %v2418_v29, 0  ;;  %v2457_v60 = vld [vmem:[%s2249_s29 + $0x30] sm:$0xff] }
  0x56   : > { %3739 = vst [vmem:[#allocation19_spill] sm:$0xff] %v2412_v27  ;;  %1886 = vpow2.f32 %v413_v4  ;;  %v340_v35 = vsub.f32 %v2346_v42, %v2412_v27  ;;  %v349_v36 = vsub.f32 %v2349_v43, %v2412_v27  ;;  %v358_v37 = vsub.f32 %v2374_v57, %v2412_v27 }
  0x57   : > { %1888 = vpow2.f32 %v431_v14  ;;  %v367_v41 = vsub.f32 %v2388_v0, %v2412_v27  ;;  %v321_v44 = vmax.f32 %v320_v12, %v2415_v28  ;;  %v2443_v46 = vsel %vm551_vm3, %v2277_v7, 0.0  ;;  %v2460_v7 = vld [vmem:[%s2249_s29 + $0x78] sm:$0xff]  ;;  %v2523_v0 = vld [vmem:[%s2249_s29 + $0x108] sm:$0xff] }
  0x58   : > { %1890 = vpow2.f32 %v373_v24  ;;  %v381_v45 = vmul.f32 1.442695, %v340_v35  ;;  %v399_v49 = vmul.f32 1.442695, %v349_v36  ;;  %v330_v52 = vmax.f32 %v329_v34, %v2434_v39  ;;  %v2487_v36 = vld [vmem:[%s2257_s19 + $0x20] sm:$0xff]  ;;  %3745 = vst [vmem:[#allocation25_spill] sm:$0xff] %v2523_v0 }
  0x59   : > { %v2445_v48 = vpop.eup %1866  ;;  %1892 = vpow2.f32 %v391_v26  ;;  %v2448_v50 = vmax.f32 %v321_v44, %v2431_v38  ;;  %v417_v55 = vmul.f32 1.442695, %v358_v37  ;;  %v435_v59 = vmul.f32 1.442695, %v367_v41 }
  0x5a   : > { %v2454_v53 = vpop.eup %1868  ;;  %1894 = vpow2.f32 %v409_v30  ;;  %v2477_v24 = vmax.f32 %v330_v52, %v2451_v51  ;;  %v326_v34 = vmax.f32 %v2457_v60, %v2460_v7  ;;  %vm3710_vm6 = vcmp.eq.s32.totalorder %v2487_v36, 0 }
  0x5b   : > { %3741 = vst [vmem:[#allocation21_spill] sm:$0xff] %v2448_v50  ;;  %3743 = vst [vmem:[#allocation23_spill] sm:$0xff] %v2454_v53  ;;  %v2462_v61 = vpop.eup %1870  ;;  %v449_v62 = vadd.f32 %v2454_v53, %v2445_v48  ;;  %1896 = vpow2.f32 %v427_v40  ;;  %v339_v63 = vsub.f32 %v2391_v1, %v2448_v50  ;;  %v348_v4 = vsub.f32 %v2396_v9, %v2448_v50 }
  0x5c   : > { %v2470_v5 = vpop.eup %1872  ;;  %1898 = vpow2.f32 %v381_v45  ;;  %v357_v14 = vsub.f32 %v2415_v28, %v2448_v50  ;;  %v366_v20 = vsub.f32 %v2431_v38, %v2448_v50  ;;  %3744 = vst [vmem:[#allocation24_spill] sm:$0xff] %v2477_v24  ;;  %v342_v41 = vsub.f32 %v2399_v10, %v2477_v24 }
  0x5d   : > { %v2479_v26 = vpop.eup %1874  ;;  %v450_v30 = vadd.f32 %v2462_v61, %v449_v62  ;;  %1900 = vpow2.f32 %v399_v49  ;;  %v379_v12 = vmul.f32 1.442695, %v339_v63  ;;  %v397_v37 = vmul.f32 1.442695, %v348_v4  ;;  %v2511_v4 = vld [vmem:[%s2257_s19 + $0x28] sm:$0xff] }
  0x5e   : > { %v2484_v35 = vpop.eup %1876  ;;  %1902 = vpow2.f32 %v417_v55  ;;  %v415_v40 = vmul.f32 1.442695, %v357_v14  ;;  %v351_v52 = vsub.f32 %v2402_v11, %v2477_v24  ;;  %v2501_v55 = vld [vmem:[%s2249_s29 + $0xc0] sm:$0xff]  ;;  %v2508_v63 = vsel %vm3703_vm5, %v2313_v22, 0.0 }
  0x5f   : > { %v2491_v44 = vpop.eup %1878  ;;  %v2494_v45 = vadd.f32 %v2470_v5, %v450_v30  ;;  %v443_v49 = vadd.f32 %v2484_v35, %v2479_v26  ;;  %1904 = vpow2.f32 %v435_v59  ;;  %v433_v14 = vmul.f32 1.442695, %v366_v20 }
  0x60   : > { %v2503_v62 = vpop.eup %1880  ;;  %1906 = vpow2.f32 %v379_v12  ;;  %v360_v59 = vsub.f32 %v2434_v39, %v2477_v24  ;;  %v369_v22 = vsub.f32 %v2451_v51, %v2477_v24  ;;  %v2530_v20 = vsel %vm3710_vm6, %v2391_v1, 0.0 }
  0x61   : > { %v2515_v30 = vpop.eup %1882  ;;  %1908 = vrcp.f32 %v2494_v45  ;;  %v444_v27 = vadd.f32 %v2491_v44, %v443_v49  ;;  %v385_v12 = vmul.f32 1.442695, %v342_v41  ;;  %v327_v33 = vmax.f32 %v326_v34, %v2501_v55  ;;  %v2537_v49 = vld [vmem:[%s2249_s29 + $0x88] sm:$0xff] }
  0x62   : > { %v2525_v50 = vpop.eup %1884  ;;  %1910 = vpow2.f32 %v397_v37  ;;  %vm3708_vm7 = vcmp.eq.s32.totalorder %v2511_v4, 0  ;;  %v403_v1 = vmul.f32 1.442695, %v351_v52  ;;  %v421_v34 = vmul.f32 1.442695, %v360_v59  ;;  %v2571_v59 = vld [vmem:[%s2249_s29 + $0xd0] sm:$0xff] }
  0x63   : > { %3746 = vst [vmem:[#allocation26_spill] sm:$0xff] %v2525_v50  ;;  %v2539_v19 = vpop.eup %1886  ;;  %v2542_v24 = vadd.f32 %v2503_v62, %v444_v27  ;;  %v452_v37 = vadd.f32 %v2525_v50, %v2515_v30  ;;  %1912 = vpow2.f32 %v415_v40  ;;  %v2550_v51 = vmax.f32 %v327_v33, %v2523_v0 }
  0x64   : > { %3747 = vst [vmem:[#allocation27_spill] sm:$0xff] %v2539_v19  ;;  %v2547_v41 = vpop.eup %1888  ;;  %1914 = vpow2.f32 %v433_v14  ;;  %v2554_v38 = vadd.f32 %v2443_v46, %v2379_v58  ;;  %v439_v40 = vmul.f32 1.442695, %v369_v22  ;;  %v332_v52 = vmax.f32 %v2534_v56, %v2537_v49 }
  0x65   : > { %3748 = vst [vmem:[#allocation28_spill] sm:$0xff] %v2547_v41  ;;  %3749 = vst [vmem:[#allocation29_spill] sm:$0xff] %v2550_v51  ;;  %v2556_v27 = vpop.eup %1890  ;;  %1916 = vrcp.f32 %v2542_v24  ;;  %v453_v32 = vadd.f32 %v2539_v19, %v452_v37  ;;  %v341_v33 = vsub.f32 %v2457_v60, %v2550_v51  ;;  %v350_v58 = vsub.f32 %v2460_v7, %v2550_v51 }
  0x66   : > { %v2562_v14 = vpop.eup %1892  ;;  %1918 = vpow2.f32 %v385_v12  ;;  %v359_v46 = vsub.f32 %v2501_v55, %v2550_v51  ;;  %v368_v12 = vsub.f32 %v2523_v0, %v2550_v51  ;;  %vm552_vm8 = vcmp.eq.s32.totalorder %v2418_v29, 1 }
  0x67   : > { %3750 = vst [vmem:[#allocation30_spill] sm:$0xff] %v2562_v14  ;;  %v2573_v37 = vpop.eup %1894  ;;  %v2576_v22 = vadd.f32 %v2547_v41, %v453_v32  ;;  %v446_v19 = vadd.f32 %v2562_v14, %v2556_v27  ;;  %1920 = vpow2.f32 %v403_v1  ;;  %v383_v21 = vmul.f32 1.442695, %v341_v33 }
  0x68   : > { %3751 = vst [vmem:[#allocation31_spill] sm:$0xff] %v2573_v37  ;;  %v2582_v50 = vpop.eup %1896  ;;  %1922 = vpow2.f32 %v421_v34  ;;  %v401_v47 = vmul.f32 1.442695, %v350_v58  ;;  %v419_v1 = vmul.f32 1.442695, %v359_v46  ;;  %v333_v14 = vmax.f32 %v332_v52, %v2571_v59  ;;  %v2617_v46 = vld [vmem:[%s2257_s19 + $0x38] sm:$0xff] }
  0x69   : > { %3752 = vst [vmem:[#allocation32_spill] sm:$0xff] %v2576_v22  ;;  %v2588_v53 = vpop.eup %1898  ;;  %1924 = vrcp.f32 %v2576_v22  ;;  %v447_v32 = vadd.f32 %v2573_v37, %v446_v19  ;;  %v437_v34 = vmul.f32 1.442695, %v368_v12  ;;  %v1555_v33 = vsel %vm552_vm8, %v2316_v23, 0.0 }
  0x6a   : > { %v2593_v51 = vpop.eup %1900  ;;  %1926 = vpow2.f32 %v439_v40  ;;  %vm555_vm9 = vcmp.eq.s32.totalorder %v2487_v36, 1  ;;  %v2607_v52 = vmax.f32 %v333_v14, %v2585_v6  ;;  %v2614_v23 = vsel %vm3708_vm7, %v2346_v42, 0.0 }
  0x6b   : > { %3754 = vst [vmem:[#allocation34_spill] sm:$0xff] %v2593_v51  ;;  %v2599_v58 = vpop.eup %1902  ;;  %v2602_v0 = vadd.f32 %v2582_v50, %v447_v32  ;;  %v458_v19 = vadd.f32 %v2593_v51, %v2588_v53  ;;  %1928 = vpow2.f32 %v383_v21  ;;  %v2620_v12 = vadd.f32 %v1555_v33, %v2508_v63 }
  0x6c   : > { %3755 = vst [vmem:[#allocation35_spill] sm:$0xff] %v2599_v58  ;;  %3756 = vst [vmem:[#allocation36_spill] sm:$0xff] %v2607_v52  ;;  %v2609_v40 = vpop.eup %1904  ;;  %1930 = vpow2.f32 %v401_v47  ;;  %v1558_v21 = vsel %vm555_vm9, %v2396_v9, 0.0  ;;  %v343_v42 = vsub.f32 %v2534_v56, %v2607_v52  ;;  %v352_v47 = vsub.f32 %v2537_v49, %v2607_v52 }
  0x6d   : > { %3757 = vst [vmem:[#allocation37_spill] sm:$0xff] %v2609_v40  ;;  %v2625_v14 = vpop.eup %1906  ;;  %1932 = vrcp.f32 %v2602_v0  ;;  %v459_v32 = vadd.f32 %v2599_v58, %v458_v19  ;;  %v361_v63 = vsub.f32 %v2571_v59, %v2607_v52  ;;  %v370_v9 = vsub.f32 %v2585_v6, %v2607_v52 }
  0x6e   : > { %v2633_v37 = vpop.eup %1908  ;;  %1934 = vpow2.f32 %v419_v1  ;;  %v2640_v33 = vadd.f32 %v1558_v21, %v2530_v20  ;;  %vm3713_vm10 = vcmp.eq.s32.totalorder %v2617_v46, 0  ;;  %v2653_v1 = vld [vmem:[%s2257_s19 + $0x30] sm:$0xff]  ;;  %v387_v22 = vmul.f32 1.442695, %v343_v42 }
  0x6f   : > { %v2642_v19 = vpop.eup %1910  ;;  %v2646_v58 = vmul.f32 %v2633_v37, %v2445_v48  ;;  %v2649_v51 = vadd.f32 %v2609_v40, %v459_v32  ;;  %1936 = vpow2.f32 %v437_v34  ;;  %v405_v21 = vmul.f32 1.442695, %v352_v47  ;;  %v2667_v40 = vld [vmem:[%s2257_s19 + $0x40] sm:$0xff] }
  0x70   : > { %v2655_v52 = vpop.eup %1912  ;;  %v455_v20 = vadd.f32 %v2642_v19, %v2625_v14  ;;  %v423_v6 = vmul.f32 1.442695, %v361_v63  ;;  %vm554_vm11 = vcmp.eq.s32.totalorder %v2366_v54, 1  ;;  %v441_v34 = vmul.f32 1.442695, %v370_v9 }
  0x71   : > { %3758 = vst [vmem:[#allocation38_spill] sm:$0xff] %v2646_v58  ;;  %3759 = vst [vmem:[#allocation39_spill] sm:$0xff] %v2655_v52  ;;  %v2660_v48 = vpop.eup %1914  ;;  %v580_v32 = vsel %vm3695_vm0, %v2646_v58, 0.0  ;;  %1938 = vrcp.f32 %v2649_v51  ;;  %v1557_v42 = vsel %vm554_vm11, %v2291_v13, 0.0  ;;  %vm3714_vm12 = vcmp.eq.s32.totalorder %v2653_v1, 0 }
  0x72   : > { %v2672_v41 = vpop.eup %1916  ;;  %618 = vadd.xlane.f32.xlu1 %v580_v32  ;;  %v456_v47 = vadd.f32 %v2655_v52, %v455_v20  ;;  %1940 = vpow2.f32 %v387_v22  ;;  %v2677_v63 = vadd.f32 %v1557_v42, %v2407_v17  ;;  %v1551_v13 = vsel %vm3714_vm12, %v2457_v60, 0.0 }
  0x73   : > { %v2679_v58 = vpop.eup %1918  ;;  %v2683_v9 = vmul.f32 %v2672_v41, %v2479_v26  ;;  %1942 = vpow2.f32 %v405_v21  ;;  %vm3722_vm13 = vcmp.eq.s32.totalorder %v2653_v1, 1  ;;  %vm3720_vm14 = vcmp.eq.s32.totalorder %v2667_v40, 0 }
  0x74   : > { %v2689_v20 = vpop.eup %1920  ;;  %v2692_v22 = vadd.f32 %v2660_v48, %v456_v47  ;;  %1944 = vpow2.f32 %v423_v6  ;;  %v1560_v17 = vsel %vm3722_vm13, %v2460_v7, 0.0  ;;  %vm3698_vm15 = vcmp.eq.s32.totalorder %v2511_v4, 1 }
  0x75   : > { %3760 = vst [vmem:[#allocation40_spill] sm:$0xff] %v2683_v9  ;;  %v2698_v26 = vpop.eup %1922  ;;  %v578_v60 = vsel %vm3697_vm2, %v2683_v9, 0.0  ;;  %v464_v21 = vadd.f32 %v2689_v20, %v2679_v58  ;;  %1946 = vpow2.f32 %v441_v34  ;;  %v1553_v6 = vsel %vm3720_vm14, %v2534_v56, 0.0 }
  0x76   : > { %v2706_v32 = vpop.eup %1924  ;;  %614 = vadd.xlane.f32.xlu0 %v578_v60  ;;  %1948 = vrcp.f32 %v2692_v22  ;;  %v2712_v7 = vadd.f32 %v1560_v17, %v1551_v13  ;;  %v1559_v42 = vsel %vm3698_vm15, %v2349_v43, 0.0  ;;  %vm3721_vm0 = vcmp.eq.s32.totalorder %v2667_v40, 1 }
  0x77   : > { %v2717_v47 = vpop.eup %1926  ;;  %v2721_v34 = vmul.f32 %v2706_v32, %v2515_v30  ;;  %v465_v60 = vadd.f32 %v2698_v26, %v464_v21  ;;  %v1596_v9 = vadd.f32 %v1559_v42, %v2614_v23  ;;  %v1552_v56 = vsel %vm3713_vm10, %v2399_v10, 0.0 }
  0x78   : > { %3761 = vst [vmem:[#allocation41_spill] sm:$0xff] %v2717_v47  ;;  %v2726_v52 = vpop.eup %1928  ;;  %v1562_v43 = vsel %vm3721_vm0, %v2537_v49, 0.0  ;;  %vm3702_vm2 = vcmp.eq.s32.totalorder %v2617_v46, 1  ;;  %v2737_v30 = vmul.f32 %v2672_v41, %v2491_v44  ;;  %vm561_vm15 = vcmp.eq.s32.totalorder %v2418_v29, 2 }
  0x79   : > { %3762 = vst [vmem:[#allocation42_spill] sm:$0xff] %v2721_v34  ;;  %v2739_v13 = vpop.eup %1930  ;;  %v581_v23 = vsel %vm3701_vm4, %v2721_v34, 0.0  ;;  %v2745_v17 = vadd.f32 %v2717_v47, %v465_v60  ;;  %v2747_v10 = vadd.f32 %v1562_v43, %v1553_v6  ;;  %v1561_v21 = vsel %vm3702_vm2, %v2402_v11, 0.0 }
  0x7a   : > { %v2750_v49 = vpop.eup %1932  ;;  %620 = vadd.xlane.f32.xlu1 %v581_v23  ;;  %v461_v44 = vadd.f32 %v2739_v13, %v2726_v52  ;;  %v1564_v42 = vsel %vm561_vm15, %v2320_v25, 0.0  ;;  %v1602_v43 = vadd.f32 %v1561_v21, %v1552_v56  ;;  %vm3704_vm4 = vcmp.eq.s32.totalorder %v2331_v31, 2 }
  0x7b   : > { %3763 = vst [vmem:[#allocation43_spill] sm:$0xff] %v2745_v17  ;;  %v2760_v60 = vpop.eup %1934  ;;  %v2764_v6 = vmul.f32 %v2750_v49, %v2556_v27  ;;  %1950 = vrcp.f32 %v2745_v17  ;;  %v2771_v34 = vadd.f32 %v2620_v12, %v1564_v42  ;;  %v1563_v11 = vsel %vm3704_vm4, %v2280_v8, 0.0 }
  0x7c   : > { %v2767_v23 = vpop.eup %1936  ;;  %v462_v47 = vadd.f32 %v2760_v60, %v461_v44  ;;  %v1582_v44 = vadd.f32 %v2554_v38, %v1563_v11  ;;  %vm3705_vm2 = vcmp.eq.s32.totalorder %v2366_v54, 2  ;;  %vm565_vm4 = vcmp.eq.s32.totalorder %v2511_v4, 2 }
  0x7d   : > { %v579_v25 = vsel %vm3703_vm5, %v2764_v6, 0.0  ;;  %v1566_v8 = vsel %vm3705_vm2, %v2299_v16, 0.0  ;;  %vm562_vm5 = vcmp.eq.s32.totalorder %v2269_v3, 2  ;;  %vm3709_vm2 = vcmp.eq.s32.totalorder %v2487_v36, 2 }
  0x7e   : > { %v2780_v27 = vpop.eup %1938  ;;  %616 = vadd.xlane.f32.xlu0 %v579_v25  ;;  %v2783_v56 = vadd.f32 %v2767_v23, %v462_v47  ;;  %v2801_v38 = vadd.f32 %v2677_v63, %v1566_v8  ;;  %v2805_v47 = vmul.f32 %v2633_v37, %v2462_v61  ;;  %v1568_v17 = vsel %vm565_vm4, %v2374_v57, 0.0 }
  0x7f   : > { %v2787_v12 = vpop.eup %1940  ;;  %v2791_v21 = vmul.f32 %v2780_v27, %v2588_v53  ;;  %v1565_v53 = vsel %vm562_vm5, %v2266_v2, 0.0 }
  0x80   : > { %v2797_v42 = vpop.eup %1942  ;;  %1952 = vrcp.f32 %v2783_v56  ;;  %v1588_v63 = vadd.f32 %v2303_v18, %v1565_v53  ;;  %v2835_v53 = vadd.f32 %v1596_v9, %v1568_v17  ;;  %v2859_v9 = vmul.f32 %v2672_v41, %v2503_v62 }
  0x81   : > { %3764 = vst [vmem:[#allocation44_spill] sm:$0xff] %v2791_v21  ;;  %v2810_v25 = vpop.eup %1944  ;;  %v583_v16 = vsel %vm3708_vm7, %v2791_v21, 0.0  ;;  %v467_v11 = vadd.f32 %v2797_v42, %v2787_v12  ;;  %v1567_v21 = vsel %vm3709_vm2, %v2415_v28, 0.0  ;;  %vm3723_vm7 = vcmp.eq.s32.totalorder %v2617_v46, 2 }
  0x82   : > { %v2818_v8 = vpop.eup %1946  ;;  %624 = vadd.xlane.f32.xlu1 %v583_v16  ;;  %v1570_v57 = vsel %vm3723_vm7, %v2434_v39, 0.0  ;;  %vm3711_vm2 = vcmp.eq.s32.totalorder %v2653_v1, 2  ;;  %v2885_v62 = vmul.f32 %v2633_v37, %v2470_v5 }
  0x83   : > { %3765 = vst [vmem:[#allocation45_spill] sm:$0xff] %v2818_v8  ;;  %v2822_v61 = vpop.eup %1948  ;;  %v468_v2 = vadd.f32 %v2810_v25, %v467_v11  ;;  %v2842_v11 = vadd.f32 %v2640_v33, %v1567_v21  ;;  %v1569_v33 = vsel %vm3711_vm2, %v2501_v55, 0.0  ;;  %v2873_v21 = vmul.f32 %v2672_v41, %v2484_v35 }
  0x84   : > { %v2833_v18 = vmul.f32 %v2822_v61, %v2625_v14  ;;  %v2850_v14 = vadd.f32 %v1602_v43, %v1570_v57  ;;  %v2864_v17 = vadd.f32 %v2712_v7, %v1569_v33  ;;  %vm3724_vm2 = vcmp.eq.s32.totalorder %v2667_v40, 2  ;;  %v3773_v33 = vld [vmem:[#allocation28_spill] sm:$0xff] }
  0x85   : > { %v2839_v16 = vadd.f32 %v2818_v8, %v468_v2 }
  0x86   : > { %v582_v28 = vsel %vm3710_vm6, %v2833_v18, 0.0  ;;  %3767 = vst [vmem:[#allocation47_spill] sm:$0xff] %v2850_v14  ;;  %vm3712_vm6 = vcmp.eq.s32.totalorder %v2331_v31, 3 }
  0x87   : > { %3766 = vst [vmem:[#allocation46_spill] sm:$0xff] %v2839_v16  ;;  %622 = vadd.xlane.f32.xlu0 %v582_v28  ;;  %1954 = vrcp.f32 %v2839_v16  ;;  %v1572_v55 = vsel %vm3712_vm6, %v2296_v15, 0.0  ;;  %vm571_vm6 = vcmp.eq.s32.totalorder %v2269_v3, 3  ;;  %v2899_v15 = vmul.f32 %v2750_v49, %v2582_v50  ;;  %v3783_v16 = vld [vmem:[#allocation34_spill] sm:$0xff] }
  0x88   : > { %v2861_v39 = vpop.eup %1950  ;;  %1956 = vlog2.f32 %v2542_v24  ;;  %v1571_v24 = vsel %vm3724_vm2, %v2571_v59, 0.0  ;;  %v2891_v41 = vadd.f32 %v1582_v44, %v1572_v55  ;;  %v3770_v59 = vld [vmem:[#allocation23_spill] sm:$0xff]  ;;  %v2937_v55 = vmul.f32 %v2706_v32, %v3773_v33 }
  0x89   : > { %v2869_v43 = vmul.f32 %v2861_v39, %v2679_v58  ;;  %1958 = vlog2.f32 %v2494_v45  ;;  %v2894_v58 = vadd.f32 %v2747_v10, %v1571_v24  ;;  %v587_v45 = vsel %vm551_vm3, %v2873_v21, 0.0  ;;  %v3771_v10 = vld [vmem:[#allocation11_spill] sm:$0xff]  ;;  %v3774_v24 = vld [vmem:[#allocation32_spill] sm:$0xff] }
  0x8a   : > { %1960 = vlog2.f32 %v2602_v0  ;;  %v2909_v7 = vmul.f32 %v2633_v37, %v3770_v59  ;;  %v1574_v44 = vsel %vm571_vm6, %v3771_v10, 0.0  ;;  %v3772_v0 = vld [vmem:[#allocation16_spill] sm:$0xff]  ;;  %v3776_v59 = vld [vmem:[#allocation30_spill] sm:$0xff] }
  0x8b   : > { %3768 = vst [vmem:[#allocation48_spill] sm:$0xff] %v2869_v43  ;;  %v585_v35 = vsel %vm3713_vm10, %v2869_v43, 0.0  ;;  %3769 = vst [vmem:[#allocation49_spill] sm:$0xff] %v2894_v58  ;;  %v2918_v2 = vadd.f32 %v1588_v63, %v1574_v44  ;;  %vm570_vm10 = vcmp.eq.s32.totalorder %v2418_v29, 3  ;;  %v2933_v63 = vmul.f32 %v2822_v61, %v2642_v19  ;;  %v3782_v58 = vld [vmem:[#allocation17_spill] sm:$0xff] }
  0x8c   : > { %628 = vadd.xlane.f32.xlu1 %v585_v35  ;;  %v1573_v57 = vsel %vm570_vm10, %v3772_v0, 0.0  ;;  %1962 = vlog2.f32 %v3774_v24  ;;  %v3775_v35 = vld [vmem:[#allocation13_spill] sm:$0xff]  ;;  %v2948_v10 = vmul.f32 %v2750_v49, %v3776_v59  ;;  %v3778_v24 = vld [vmem:[#allocation26_spill] sm:$0xff]  ;;  %v3780_v59 = vld [vmem:[#allocation20_spill] sm:$0xff] }
  0x8d   : > { %v2902_v5 = vpop.eup %1952  ;;  %v1586_v28 = vadd.f32 %v2771_v34, %v1573_v57  ;;  %v591_v57 = vsel %vm555_vm9, %v2933_v63, 0.0  ;;  %1964 = vlog2.f32 %v2692_v22 }
  0x8e   : > { %v2916_v50 = vmul.f32 %v2902_v5, %v2726_v52  ;;  %v589_v52 = vsel %vm3715_vm1, %v2909_v7, 0.0  ;;  %vm573_vm1 = vcmp.eq.s32.totalorder %v2487_v36, 3  ;;  %v588_v8 = vsel %vm552_vm8, %v2948_v10, 0.0 }
  0x8f   : > { %v1576_v22 = vsel %vm573_vm1, %v3780_v59, 0.0  ;;  %1966 = vlog2.f32 %v2649_v51 }
  0x90   : > { %v584_v37 = vsel %vm3714_vm12, %v2916_v50, 0.0  ;;  %632 = vadd.xlane.f32.xlu1 %v587_v45  ;;  %vm572_vm12 = vcmp.eq.s32.totalorder %v2366_v54, 3  ;;  %1968 = vlog2.f32 %v2783_v56  ;;  %v3796_v56 = vld [vmem:[#allocation19_spill] sm:$0xff] }
  0x91   : > { %626 = vadd.xlane.f32.xlu0 %v584_v37  ;;  %v1575_v34 = vsel %vm572_vm12, %v3775_v35, 0.0  ;;  %v2960_v37 = vmul.f32 %v2902_v5, %v2739_v13  ;;  %v2973_v13 = vmul.f32 %v2706_v32, %v3778_v24  ;;  %v3779_v35 = vld [vmem:[#allocation14_spill] sm:$0xff]  ;;  %v3781_v24 = vld [vmem:[#allocation12_spill] sm:$0xff] }
  0x92   : > { %v1592_v19 = vadd.f32 %v2801_v38, %v1575_v34 }
  0x93   : > { %v590_v43 = vsel %vm554_vm11, %v2973_v13, 0.0 }
  0x94   : > { %v2944_v45 = vpop.eup %1954  ;;  %636 = vadd.xlane.f32.xlu1 %v589_v52  ;;  %v2964_v52 = vmul.f32 %v2822_v61, %v2660_v48 }
  0x95   : > { %v1957_v44 = vpop.eup %1956  ;;  %v2953_v0 = vmul.f32 %v2944_v45, %v2787_v12 }
  0x96   : > { %v516_v33 = vmul.f32 0.6931472, %v1957_v44  ;;  %v1959_v38 = vpop.eup %1958 }
  0x97   : > { %3777 = vst [vmem:[#allocation23_spill] sm:$0xff] %v2953_v0  ;;  %v586_v12 = vsel %vm3720_vm14, %v2953_v0, 0.0  ;;  %v520_v48 = vmul.f32 0.6931472, %v1959_v38  ;;  %v1961_v44 = vpop.eup %1960  ;;  %vm3786_vm14 = vcmp.eq.s32.totalorder %v2511_v4, 1 }
  0x98   : > { %630 = vadd.xlane.f32.xlu0 %v586_v12  ;;  %640 = vadd.xlane.f32.xlu1 %v591_v57  ;;  %v533_v34 = vadd.f32 %v516_v33, %v3779_v35  ;;  %v593_v57 = vsel %vm3722_vm13, %v2960_v37, 0.0  ;;  %v2987_v12 = vmul.f32 %v2944_v45, %v2797_v42  ;;  %v1595_v33 = vadd.f32 %v2842_v11, %v1576_v22 }
  0x99   : > { %v535_v35 = vadd.f32 %v520_v48, %v3781_v24  ;;  %v518_v59 = vmul.f32 0.6931472, %v1961_v44  ;;  %v2999_v42 = vmul.f32 %v2780_v27, %v3783_v16  ;;  %v3785_v48 = vld [vmem:[#allocation37_spill] sm:$0xff]  ;;  %vm3793_vm13 = vcmp.eq.s32.totalorder %v2331_v31, 2 }
  0x9a   : > { %v1608_v38 = vsub.f32 %v533_v34, %v2891_v41  ;;  %v595_v11 = vsel %vm3721_vm0, %v2987_v12, 0.0  ;;  %v3784_v41 = vld [vmem:[#allocation31_spill] sm:$0xff]  ;;  %vm3790_vm0 = vcmp.eq.s32.totalorder %v2366_v54, 2 }
  0x9b   : > { %v1610_v0 = vsub.f32 %v535_v35, %v2918_v2  ;;  %v534_v14 = vadd.f32 %v518_v59, %v3782_v58  ;;  %v1963_v2 = vpop.eup %1962  ;;  %v3010_v58 = vmul.f32 %v2780_v27, %v3785_v48  ;;  %v592_v16 = vsel %vm3786_vm14, %v2999_v42, 0.0 }
  0x9c   : > { %634 = vadd.xlane.f32.xlu0 %v588_v8  ;;  %644 = vadd.xlane.f32.xlu1 %v593_v57  ;;  %v3006_v8 = vmul.f32 %v2750_v49, %v3784_v41  ;;  %v522_v44 = vmul.f32 0.6931472, %v1963_v2  ;;  %v3018_v49 = vmul.f32 %v2861_v39, %v2689_v20  ;;  %v3788_v57 = vld [vmem:[#allocation15_spill] sm:$0xff]  ;;  %v1965_v51 = vpop.eup %1964  ;;  %vm3789_vm14 = vcmp.eq.s32.totalorder %v2617_v46, 1  ;;  %v3792_v2 = vld [vmem:[#allocation21_spill] sm:$0xff] }
  0x9d   : > { %v1609_v34 = vsub.f32 %v534_v14, %v1586_v28  ;;  %v3787_v28 = vld [vmem:[#allocation27_spill] sm:$0xff]  ;;  %v524_v59 = vmul.f32 0.6931472, %v1965_v51 }
  0x9e   : > { %v597_v14 = vsel %vm561_vm15, %v3006_v8, 0.0  ;;  %v594_v20 = vsel %vm3789_vm14, %v3018_v49, 0.0  ;;  %v3791_v41 = vld [vmem:[#allocation35_spill] sm:$0xff]  ;;  %vm3798_vm14 = vcmp.eq.s32.totalorder %v2331_v31, 3 }
  0x9f   : > { %v1617_v22 = vadd.f32 %v1609_v34, %v1608_v38  ;;  %v536_v38 = vadd.f32 %v522_v44, %v3788_v57  ;;  %v3047_v44 = vmul.f32 %v2861_v39, %v2698_v26  ;;  %v598_v26 = vsel %vm562_vm5, %v2805_v47, 0.0  ;;  %v3795_v57 = vld [vmem:[#allocation39_spill] sm:$0xff] }
  0xa0   : > { %638 = vadd.xlane.f32.xlu0 %v590_v43  ;;  %648 = vadd.xlane.f32.xlu1 %v595_v11  ;;  %v3025_v43 = vmul.f32 %v2706_v32, %v3787_v28  ;;  %v3036_v32 = vmul.f32 %v2780_v27, %v3791_v41  ;;  %v3051_v27 = vmul.f32 %v2902_v5, %v2767_v23  ;;  %v1967_v28 = vpop.eup %1966 }
  0xa1   : > { %v1618_v24 = vadd.f32 %v1617_v22, %v1610_v0  ;;  %v1611_v35 = vsub.f32 %v536_v38, %v1592_v19  ;;  %v537_v0 = vadd.f32 %v524_v59, %v3792_v2  ;;  %v596_v19 = vsel %vm3793_vm13, %v2737_v30, 0.0  ;;  %v1969_v2 = vpop.eup %1968 }
  0xa2   : > { %v599_v11 = vsel %vm3790_vm0, %v3025_v43, 0.0  ;;  %v601_v22 = vsel %vm565_vm4, %v3036_v32, 0.0  ;;  %vm574_vm0 = vcmp.eq.s32.totalorder %v2511_v4, 3  ;;  %v3065_v23 = vmul.f32 %v2822_v61, %v3795_v57 }
  0xa3   : > { %v1619_v34 = vadd.f32 %v1618_v24, %v1611_v35  ;;  %v1612_v48 = vsub.f32 %v537_v0, %v1595_v33  ;;  %v3794_v33 = vld [vmem:[#allocation18_spill] sm:$0xff]  ;;  %v603_v38 = vsel %vm3723_vm7, %v3047_v44, 0.0  ;;  %v526_v24 = vmul.f32 0.6931472, %v1967_v28  ;;  %v3802_v28 = vld [vmem:[#allocation40_spill] sm:$0xff] }
  0xa4   : > { %642 = vadd.xlane.f32.xlu0 %v592_v16  ;;  %652 = vadd.xlane.f32.xlu1 %v597_v14  ;;  %v1577_v14 = vsel %vm574_vm0, %v3794_v33, 0.0  ;;  %vm3797_vm13 = vcmp.eq.s32.totalorder %v2487_v36, 2  ;;  %v3081_v61 = vmul.f32 %v2902_v5, %v2760_v60  ;;  %vm3799_vm7 = vcmp.eq.s32.totalorder %v2653_v1, 2  ;;  %v3800_v5 = vld [vmem:[#allocation25_spill] sm:$0xff] }
  0xa5   : > { %v3053_v16 = vadd.f32 %v1619_v34, %v1612_v48  ;;  %v3071_v51 = vadd.f32 %v2835_v53, %v1577_v14  ;;  %v3074_v35 = vadd.f32 %v526_v24, %v3796_v56  ;;  %v600_v59 = vsel %vm3797_vm13, %v3065_v23, 0.0 }
  0xa6   : > { %v3093_v41 = vmul.f32 %v2944_v45, %v2810_v25  ;;  %v607_v60 = vsel %vm571_vm6, %v2885_v62, 0.0  ;;  %vm575_vm13 = vcmp.eq.s32.totalorder %v2653_v1, 3  ;;  %v528_v48 = vmul.f32 0.6931472, %v1969_v2 }
  0xa7   : > { %v1613_v53 = vsub.f32 %v3074_v35, %v3071_v51  ;;  %v1578_v34 = vsel %vm575_vm13, %v3800_v5, 0.0  ;;  %v606_v33 = vsel %vm570_vm10, %v2899_v15, 0.0 }
  0xa8   : > { %646 = vadd.xlane.f32.xlu0 %v594_v20  ;;  %656 = vadd.xlane.f32.xlu1 %v599_v11  ;;  %v605_v20 = vsel %vm3798_vm14, %v2859_v9, 0.0  ;;  %v602_v11 = vsel %vm3799_vm7, %v3081_v61, 0.0  ;;  %v604_v0 = vsel %vm3724_vm2, %v3093_v41, 0.0  ;;  %v3106_v25 = vadd.f32 %v2864_v17, %v1578_v34 }
  0xa9   : > { %v2120_v17 = vmov 0.0   ;;  %vm3804_vm7 = vcmp.eq.s32.totalorder %v2331_v31, 0  ;;  %vm3806_vm14 = vcmp.eq.s32.totalorder %v2418_v29, 0  ;;  %vm782_vm2 = vcmask 589312  }
  0xaa   : > { %v1238_v57 = vsel %vm562_vm5, 1.0, %v2120_v17  ;;  %v1246_v56 = vsel %vm570_vm10, 1.0, %v2120_v17  ;;  %vm733_vm5 = vcmask 130112   ;;  %vm747_vm10 = vcmask 261312  }
  0xac   : > { %650 = vadd.xlane.f32.xlu0 %v596_v19  ;;  %660 = vadd.xlane.f32.xlu1 %v601_v22  ;;  %v3801_v19 = vld [vmem:[#allocation29_spill] sm:$0xff] }
  0xad   : > { %v3110_v22 = vadd.f32 %v528_v48, %v3801_v19 }
  0xaf   : > { %v1614_v14 = vsub.f32 %v3110_v22, %v3106_v25 }
  0xb0   : > { %654 = vadd.xlane.f32.xlu0 %v598_v26  ;;  %664 = vadd.xlane.f32.xlu1 %v603_v38  ;;  %v3805_v26 = vld [vmem:[#allocation42_spill] sm:$0xff] }
  0xb4   : > { %658 = vadd.xlane.f32.xlu0 %v600_v59  ;;  %668 = vadd.xlane.f32.xlu1 %v605_v20 }
  0xb8   : > { %662 = vadd.xlane.f32.xlu0 %v602_v11  ;;  %672 = vadd.xlane.f32.xlu1 %v607_v60 }
  0xbc   : > { %666 = vadd.xlane.f32.xlu0 %v604_v0  ;;  %929 = vadd.xlane.f32.xlu1 %v2764_v6  ;;  %v3803_v6 = vld [vmem:[#allocation38_spill] sm:$0xff]  ;;  %v1247_v0 = vsel %vm571_vm6, 1.0, %v2120_v17  ;;  %vm3813_vm6 = vcmp.eq.s32.totalorder %v2487_v36, 0 }
  0xc0   : > { %670 = vadd.xlane.f32.xlu0 %v606_v33  ;;  %947 = vadd.xlane.f32.xlu1 %v2948_v10  ;;  %v1218_v10 = vsel %vm3804_vm7, 1.0, %v2120_v17  ;;  %vm3808_vm7 = vcmp.eq.s32.totalorder %v2331_v31, 2 }
  0xc4   : > { %927 = vadd.xlane.f32.xlu0 %v3802_v28  ;;  %949 = vadd.xlane.f32.xlu1 %v2909_v7 }
  0xc8   : > { %945 = vadd.xlane.f32.xlu0 %v2873_v21  ;;  %965 = vadd.xlane.f32.xlu1 %v3006_v8  ;;  %v1227_v21 = vsel %vm551_vm3, 1.0, %v2120_v17  ;;  %vm3807_vm3 = vcmp.eq.s32.totalorder %v2269_v3, 0 }
  0xcc   : > { %931 = vadd.xlane.f32.xlu0 %v3803_v6  ;;  %951 = vadd.xlane.f32.xlu1 %v2973_v13  ;;  %v1237_v13 = vsel %vm561_vm15, 1.0, %v2120_v17  ;;  %vm3812_vm15 = vcmp.eq.s32.totalorder %v2366_v54, 0 }
  0xd0   : > { %963 = vadd.xlane.f32.xlu0 %v2737_v30  ;;  %981 = vadd.xlane.f32.xlu1 %v2859_v9  ;;  %v1219_v30 = vsel %vm3806_vm14, 1.0, %v2120_v17  ;;  %v1228_v9 = vsel %vm552_vm8, 1.0, %v2120_v17  ;;  %vm3809_vm8 = vcmp.eq.s32.totalorder %v2269_v3, 1  ;;  %vm3811_vm14 = vcmp.eq.s32.totalorder %v2331_v31, 3 }
  0xd1   : > { %v1229_v7 = vsel %vm3809_vm8, 1.0, %v2120_v17  ;;  %v1245_v8 = vsel %vm3811_vm14, 1.0, %v2120_v17  ;;  %v1222_v3 = vsel %vm3813_vm6, 1.0, %v2120_v17  ;;  %vm3818_vm8 = vcmp.eq.s32.totalorder %v2511_v4, 0 }
  0xd2   : > { %vm768_vm14 = vcmask 458112   ;;  %vm576_vm6 = vcmp.eq.s32.totalorder %v2617_v46, 3 }
  0xd4   : > { %933 = vadd.xlane.f32.xlu0 %v3805_v26  ;;  %1254 = vadd.xlane.f32.xlu1 %v1218_v10 }
  0xd8   : > { %967 = vadd.xlane.f32.xlu0 %v2805_v47  ;;  %1272 = vadd.xlane.f32.xlu1 %v1227_v21  ;;  %v1220_v47 = vsel %vm3807_vm3, 1.0, %v2120_v17  ;;  %v3814_v21 = vld [vmem:[#allocation43_spill] sm:$0xff]  ;;  %vm754_vm3 = vcmask 326912  }
  0xd9   : > { %1970 = vlog2.f32 %v3814_v21  ;;  %v3822_v21 = vld [vmem:[#allocation47_spill] sm:$0xff] }
  0xdc   : > { %983 = vadd.xlane.f32.xlu0 %v2899_v15  ;;  %935 = vadd.xlane.f32.xlu1 %v2833_v18  ;;  %v1236_v18 = vsel %vm3808_vm7, 1.0, %v2120_v17  ;;  %v608_v15 = vsel %vm572_vm12, %v2937_v55, 0.0  ;;  %vm761_vm7 = vcmask 392512  }
  0xe0   : > { %1256 = vadd.xlane.f32.xlu0 %v1219_v30  ;;  %969 = vadd.xlane.f32.xlu1 %v3025_v43  ;;  %v722_v43 = vlaneseq }
  0xe2   : > { %v3179_v31 = vand.u32 127, %v722_v43  ;;  %v3186_v59 = vshrl.u32 %v722_v43, 7 }
  0xe4   : > { %1274 = vadd.xlane.f32.xlu0 %v1228_v9  ;;  %1258 = vadd.xlane.f32.xlu1 %v1220_v47  ;;  %v728_v24 = vadd.s32 4294967288, %v3179_v31  ;;  %v735_v11 = vadd.s32 4294967280, %v3179_v31  ;;  %v3198_v29 = vsub.s32 %v3179_v31, %v3186_v59  ;;  %v742_v34 = vadd.s32 4294967272, %v3179_v31 }
  0xe5   : > { %v749_v48 = vadd.s32 4294967264, %v3179_v31  ;;  %v756_v6 = vadd.s32 4294967256, %v3179_v31  ;;  %v770_v9 = vadd.s32 4294967240, %v3179_v31 }
  0xe6   : > { %v3190_v20 = vsub.s32 %v728_v24, %v3186_v59  ;;  %v3204_v2 = vsub.s32 %v735_v11, %v3186_v59  ;;  %v3212_v33 = vsub.s32 %v742_v34, %v3186_v59  ;;  %v3819_v34 = vld [vmem:[#allocation22_spill] sm:$0xff] }
  0xe7   : > { %v3222_v26 = vsub.s32 %v749_v48, %v3186_v59 }
  0xe8   : > { %953 = vadd.xlane.f32.xlu0 %v2933_v63  ;;  %1290 = vadd.xlane.f32.xlu1 %v1236_v18  ;;  %v1230_v63 = vsel %vm554_vm11, 1.0, %v2120_v17  ;;  %v763_v18 = vadd.s32 4294967248, %v3179_v31  ;;  %vm3817_vm11 = vcmp.eq.s32.totalorder %v2366_v54, 2 }
  0xea   : > { %v3243_v43 = vsub.s32 %v763_v18, %v3186_v59 }
  0xec   : > { %985 = vadd.xlane.f32.xlu0 %v2885_v62  ;;  %674 = vadd.xlane.f32.xlu1 %v608_v15  ;;  %v3810_v62 = vld [vmem:[#allocation44_spill] sm:$0xff]  ;;  %v3815_v15 = vld [vmem:[#allocation46_spill] sm:$0xff] }
  0xed   : > { %1972 = vlog2.f32 %v3815_v15 }
  0xf0   : > { %1276 = vadd.xlane.f32.xlu0 %v1229_v7  ;;  %955 = vadd.xlane.f32.xlu1 %v2999_v42  ;;  %v1221_v42 = vsel %vm3812_vm15, 1.0, %v2120_v17  ;;  %v3231_v7 = vsub.s32 %v756_v6, %v3186_v59  ;;  %vm775_vm15 = vcmask 523712  }
  0xf4   : > { %1292 = vadd.xlane.f32.xlu0 %v1237_v13  ;;  %987 = vadd.xlane.f32.xlu1 %v2937_v55  ;;  %v609_v55 = vsel %vm573_vm1, %v2964_v52, 0.0  ;;  %v3816_v13 = vld [vmem:[#allocation48_spill] sm:$0xff] }
  0xf8   : > { %937 = vadd.xlane.f32.xlu0 %v3810_v62  ;;  %1278 = vadd.xlane.f32.xlu1 %v1230_v63  ;;  %v1239_v63 = vsel %vm3817_vm11, 1.0, %v2120_v17  ;;  %vm3820_vm11 = vcmp.eq.s32.totalorder %v2487_v36, 2 }
  0xfb   : > { %v619_v38 = vpop.xlane.xlu1 %618 }
  0xfc   : > { %971 = vadd.xlane.f32.xlu0 %v3065_v23  ;;  %1308 = vadd.xlane.f32.xlu1 %v1245_v8  ;;  %v739_v10 = vrot.slane %v619_v38, %v3204_v2 }
  0xff   : > { %v615_v23 = vpop.xlane.xlu0 %614 }
 0x100   : > { %1260 = vadd.xlane.f32.xlu0 %v1221_v42  ;;  %676 = vadd.xlane.f32.xlu1 %v609_v55  ;;  %v727_v19 = vrot.slane %v615_v23, %v3198_v29  ;;  %v3240_v55 = vsub.s32 %v770_v9, %v3186_v59  ;;  %v610_v23 = vsel %vm574_vm0, %v3010_v58, 0.0 }
 0x103   : > { %v621_v60 = vpop.xlane.xlu1 %620 }
 0x104   : > { %1294 = vadd.xlane.f32.xlu0 %v1238_v57  ;;  %957 = vadd.xlane.f32.xlu1 %v2960_v37  ;;  %v1231_v37 = vsel %vm555_vm9, 1.0, %v2120_v17  ;;  %vm740_vm9 = vcmask 195712   ;;  %v746_v30 = vrot.slane %v621_v60, %v3212_v33  ;;  %v777_v60 = vadd.s32 4294967232, %v3179_v31 }
 0x106   : > { %v3269_v6 = vsub.s32 %v777_v60, %v3186_v59  ;;  %v3823_v59 = vld [vmem:[#allocation49_spill] sm:$0xff] }
 0x107   : > { %v617_v5 = vpop.xlane.xlu0 %616 }
 0x108   : > { %1310 = vadd.xlane.f32.xlu0 %v1246_v56  ;;  %989 = vadd.xlane.f32.xlu1 %v2964_v52  ;;  %v732_v52 = vrot.slane %v617_v5, %v3190_v20  ;;  %v1223_v56 = vsel %vm3818_vm8, 1.0, %v2120_v17  ;;  %vm577_vm8 = vcmp.eq.s32.totalorder %v2667_v40, 3 }
 0x10b   : > { %v625_v28 = vpop.xlane.xlu1 %624 }
 0x10c   : > { %939 = vadd.xlane.f32.xlu0 %v2916_v50  ;;  %1280 = vadd.xlane.f32.xlu1 %v1231_v37  ;;  %v734_v50 = vsel %vm733_vm5, %v732_v52, %v727_v19  ;;  %v760_v57 = vrot.slane %v625_v28, %v3231_v7  ;;  %v1579_v52 = vsel %vm576_vm6, %v3819_v34, 0.0  ;;  %v1240_v19 = vsel %vm3820_vm11, 1.0, %v2120_v17  ;;  %v1971_v28 = vpop.eup %1970 }
 0x10d   : > { %v741_v47 = vsel %vm740_vm9, %v739_v10, %v734_v50  ;;  %v3821_v10 = vld [vmem:[#allocation33_spill] sm:$0xff]  ;;  %v1973_v9 = vpop.eup %1972  ;;  %vm3826_vm11 = vcmp.eq.s32.totalorder %v2511_v4, 1 }
 0x10e   : > { %v748_v42 = vsel %vm747_vm10, %v746_v30, %v741_v47  ;;  %v1604_v30 = vadd.f32 %v3822_v21, %v1579_v52  ;;  %v611_v47 = vsel %vm575_vm13, %v3051_v27, 0.0  ;;  %v1232_v51 = vsel %vm3826_vm11, 1.0, %v2120_v17  ;;  %v3828_v21 = vld [vmem:[#allocation23_spill] sm:$0xff] }
 0x10f   : > { %vm3827_vm11 = vcmp.eq.s32.totalorder %v2653_v1, 1 }
 0x110   : > { %973 = vadd.xlane.f32.xlu0 %v3036_v32  ;;  %1312 = vadd.xlane.f32.xlu1 %v1247_v0  ;;  %v623_v32 = vpop.xlane.xlu0 %622  ;;  %v1233_v54 = vsel %vm3827_vm11, 1.0, %v2120_v17  ;;  %vm3829_vm11 = vcmp.eq.s32.totalorder %v2653_v1, 0 }
 0x111   : > { %v753_v62 = vrot.slane %v623_v32, %v3222_v26  ;;  %v530_v32 = vmul.f32 0.6931472, %v1971_v28 }
 0x113   : > { %v755_v38 = vsel %vm754_vm3, %v753_v62, %v748_v42  ;;  %v3824_v62 = vld [vmem:[#allocation24_spill] sm:$0xff]  ;;  %v1621_v42 = vadd.f32 %v3053_v16, %v1613_v53 }
 0x114   : > { %1262 = vadd.xlane.f32.xlu0 %v1222_v3  ;;  %941 = vadd.xlane.f32.xlu1 %v3816_v13  ;;  %v762_v5 = vsel %vm761_vm7, %v760_v57, %v755_v38  ;;  %v1580_v3 = vsel %vm577_vm8, %v3821_v10, 0.0  ;;  %v3825_v57 = vld [vmem:[#allocation36_spill] sm:$0xff] }
 0x115   : > { %v629_v8 = vpop.xlane.xlu1 %628  ;;  %v1607_v13 = vadd.f32 %v3823_v59, %v1580_v3 }
 0x116   : > { %v774_v11 = vrot.slane %v629_v8, %v3240_v55  ;;  %v540_v8 = vadd.f32 %v530_v32, %v3824_v62  ;;  %v1224_v62 = vsel %vm3829_vm11, 1.0, %v2120_v17  ;;  %vm3834_vm11 = vcmp.eq.s32.totalorder %v2617_v46, 1 }
 0x118   : > { %1296 = vadd.xlane.f32.xlu0 %v1239_v63  ;;  %975 = vadd.xlane.f32.xlu1 %v3081_v61  ;;  %v532_v63 = vmul.f32 0.6931472, %v1973_v9 }
 0x119   : > { %v633_v24 = vpop.xlane.xlu1 %632 }
 0x11a   : > { %v627_v37 = vpop.xlane.xlu0 %626  ;;  %v541_v38 = vadd.f32 %v532_v63, %v3825_v57  ;;  %v787_v60 = vrot.slane %v633_v24, %v3198_v29 }
 0x11b   : > { %v767_v61 = vrot.slane %v627_v37, %v3243_v43 }
 0x11c   : > { %678 = vadd.xlane.f32.xlu0 %v610_v23  ;;  %1264 = vadd.xlane.f32.xlu1 %v1223_v56  ;;  %v1615_v23 = vsub.f32 %v540_v8, %v1604_v30  ;;  %v1622_v56 = vadd.f32 %v1621_v42, %v1614_v14  ;;  %v1616_v35 = vsub.f32 %v541_v38, %v1607_v13 }
 0x11d   : > { %v769_v0 = vsel %vm768_vm14, %v767_v61, %v762_v5  ;;  %v637_v48 = vpop.xlane.xlu1 %636  ;;  %v1248_v5 = vsel %vm572_vm12, 1.0, %v2120_v17  ;;  %vm916_vm12 = vcmask 1041409  }
 0x11e   : > { %v776_v50 = vsel %vm775_vm15, %v774_v11, %v769_v0  ;;  %v1623_v53 = vadd.f32 %v1622_v56, %v1615_v23  ;;  %v796_v25 = vrot.slane %v637_v48, %v3204_v2  ;;  %v1241_v56 = vsel %vm565_vm4, 1.0, %v2120_v17 }
 0x11f   : > { %vm3832_vm4 = vcmp.eq.s32.totalorder %v2653_v1, 2 }
 0x120   : > { %959 = vadd.xlane.f32.xlu0 %v3018_v49  ;;  %1298 = vadd.xlane.f32.xlu1 %v1240_v19  ;;  %v3298_v22 = vadd.f32 %v1623_v53, %v1616_v35 }
 0x121   : > { %v631_v18 = vpop.xlane.xlu0 %630  ;;  %v641_v15 = vpop.xlane.xlu1 %640 }
 0x122   : > { %v781_v49 = vrot.slane %v631_v18, %v3269_v6  ;;  %v806_v24 = vrot.slane %v641_v15, %v3222_v26 }
 0x124   : > { %v783_v11 = vsel %vm782_vm2, %v781_v49, %v776_v50  ;;  %991 = vadd.xlane.f32.xlu0 %v3010_v58  ;;  %680 = vadd.xlane.f32.xlu1 %v611_v47  ;;  %v1249_v47 = vsel %vm573_vm1, 1.0, %v2120_v17  ;;  %vm3831_vm1 = vcmp.eq.s32.totalorder %v2617_v46, 0 }
 0x125   : > { %v635_v37 = vpop.xlane.xlu0 %634  ;;  %v645_v16 = vpop.xlane.xlu1 %644 }
 0x126   : > { %v791_v61 = vrot.slane %v635_v37, %v3190_v20  ;;  %v816_v19 = vrot.slane %v645_v16, %v3243_v43 }
 0x128   : > { %v792_v14 = vsel %vm733_vm5, %v791_v61, %v787_v60  ;;  %1282 = vadd.xlane.f32.xlu0 %v1232_v51  ;;  %961 = vadd.xlane.f32.xlu1 %v2987_v12  ;;  %v1242_v61 = vsel %vm3832_vm4, 1.0, %v2120_v17  ;;  %vm918_vm4 = vcmask 1042434  }
 0x129   : > { %v639_v58 = vpop.xlane.xlu0 %638  ;;  %v649_v34 = vpop.xlane.xlu1 %648  ;;  %v797_v0 = vsel %vm740_vm9, %v796_v25, %v792_v14  ;;  %v3833_v25 = vld [vmem:[#allocation45_spill] sm:$0xff] }
 0x12a   : > { %v801_v52 = vrot.slane %v639_v58, %v3212_v33  ;;  %v826_v30 = vrot.slane %v649_v34, %v3269_v6  ;;  %v514_v14 = vmul.f32 %v2944_v45, %v3833_v25 }
 0x12c   : > { %v802_v48 = vsel %vm747_vm10, %v801_v52, %v797_v0  ;;  %1314 = vadd.xlane.f32.xlu0 %v1248_v5  ;;  %993 = vadd.xlane.f32.xlu1 %v3051_v27 }
 0x12d   : > { %v643_v12 = vpop.xlane.xlu0 %642  ;;  %v653_v28 = vpop.xlane.xlu1 %652  ;;  %v807_v10 = vsel %vm754_vm3, %v806_v24, %v802_v48  ;;  %v613_v48 = vsel %vm577_vm8, %v514_v14, 0.0 }
 0x12e   : > { %v811_v50 = vrot.slane %v643_v12, %v3231_v7  ;;  %v835_v59 = vrot.slane %v653_v28, %v3190_v20 }
 0x130   : > { %v812_v3 = vsel %vm761_vm7, %v811_v50, %v807_v10  ;;  %943 = vadd.xlane.f32.xlu0 %v3828_v21  ;;  %1284 = vadd.xlane.f32.xlu1 %v1233_v54  ;;  %v1234_v54 = vsel %vm3834_vm11, 1.0, %v2120_v17  ;;  %vm3836_vm11 = vcmp.eq.s32.totalorder %v2617_v46, 2 }
 0x131   : > { %v817_v27 = vsel %vm768_vm14, %v816_v19, %v812_v3  ;;  %v647_v32 = vpop.xlane.xlu0 %646  ;;  %v657_v9 = vpop.xlane.xlu1 %656 }
 0x132   : > { %v821_v18 = vrot.slane %v647_v32, %v3240_v55  ;;  %v845_v38 = vrot.slane %v657_v9, %v3212_v33  ;;  %v1250_v32 = vsel %vm574_vm0, 1.0, %v2120_v17  ;;  %vm3837_vm0 = vcmp.eq.s32.totalorder %v2667_v40, 2 }
 0x134   : > { %v822_v15 = vsel %vm775_vm15, %v821_v18, %v817_v27  ;;  %977 = vadd.xlane.f32.xlu0 %v3047_v44  ;;  %1316 = vadd.xlane.f32.xlu1 %v1249_v47  ;;  %v3830_v44 = vld [vmem:[#allocation41_spill] sm:$0xff]  ;;  %v1243_v47 = vsel %vm3836_vm11, 1.0, %v2120_v17 }
 0x135   : > { %v827_v13 = vsel %vm782_vm2, %v826_v30, %v822_v15  ;;  %v651_v63 = vpop.xlane.xlu0 %650  ;;  %v661_v8 = vpop.xlane.xlu1 %660  ;;  %v513_v57 = vmul.f32 %v2861_v39, %v3830_v44 }
 0x136   : > { %v831_v36 = vrot.slane %v651_v63, %v3198_v29  ;;  %v917_v42 = vsel %vm916_vm12, %v827_v13, %v783_v11  ;;  %v1225_v11 = vsel %vm3831_vm1, 1.0, %v2120_v17  ;;  %vm3835_vm1 = vcmp.eq.s32.totalorder %v2667_v40, 0 }
 0x137   : > { %v612_v39 = vsel %vm576_vm6, %v513_v57, 0.0  ;;  %v1226_v10 = vsel %vm3835_vm1, 1.0, %v2120_v17  ;;  %vm3838_vm1 = vcmp.eq.s32.totalorder %v2667_v40, 1 }
 0x138   : > { %v836_v49 = vsel %vm733_vm5, %v835_v59, %v831_v36  ;;  %1266 = vadd.xlane.f32.xlu0 %v1224_v62  ;;  %979 = vadd.xlane.f32.xlu1 %v3093_v41  ;;  %v855_v41 = vrot.slane %v661_v8, %v3231_v7  ;;  %v1244_v8 = vsel %vm3837_vm0, 1.0, %v2120_v17 }
 0x139   : > { %v655_v23 = vpop.xlane.xlu0 %654  ;;  %v665_v37 = vpop.xlane.xlu1 %664 }
 0x13a   : > { %v840_v51 = vrot.slane %v655_v23, %v3204_v2  ;;  %v865_v34 = vrot.slane %v665_v37, %v3240_v55  ;;  %v1253_v37 = vsel %vm577_vm8, 1.0, %v2120_v17 }
 0x13c   : > { %v841_v16 = vsel %vm740_vm9, %v840_v51, %v836_v49  ;;  %1300 = vadd.xlane.f32.xlu0 %v1241_v56  ;;  %1268 = vadd.xlane.f32.xlu1 %v1225_v11 }
 0x13d   : > { %v846_v35 = vsel %vm747_vm10, %v845_v38, %v841_v16  ;;  %v659_v53 = vpop.xlane.xlu0 %658  ;;  %v669_v60 = vpop.xlane.xlu1 %668  ;;  %v1235_v38 = vsel %vm3838_vm1, 1.0, %v2120_v17 }
 0x13e   : > { %v850_v58 = vrot.slane %v659_v53, %v3222_v26  ;;  %v875_v15 = vrot.slane %v669_v60, %v3198_v29 }
 0x140   : > { %v851_v5 = vsel %vm754_vm3, %v850_v58, %v846_v35  ;;  %682 = vadd.xlane.f32.xlu0 %v612_v39  ;;  %1302 = vadd.xlane.f32.xlu1 %v1242_v61  ;;  %v1252_v58 = vsel %vm576_vm6, 1.0, %v2120_v17 }
 0x141   : > { %v856_v52 = vsel %vm761_vm7, %v855_v41, %v851_v5  ;;  %v663_v24 = vpop.xlane.xlu0 %662  ;;  %v673_v0 = vpop.xlane.xlu1 %672  ;;  %v1251_v41 = vsel %vm575_vm13, 1.0, %v2120_v17  ;;  %vm920_vm13 = vcmask 1043459  }
 0x142   : > { %v860_v19 = vrot.slane %v663_v24, %v3243_v43  ;;  %v884_v30 = vrot.slane %v673_v0, %v3204_v2 }
 0x144   : > { %v861_v12 = vsel %vm768_vm14, %v860_v19, %v856_v52  ;;  %995 = vadd.xlane.f32.xlu0 %v513_v57  ;;  %684 = vadd.xlane.f32.xlu1 %v613_v48 }
 0x145   : > { %v866_v45 = vsel %vm775_vm15, %v865_v34, %v861_v12  ;;  %v667_v28 = vpop.xlane.xlu0 %666  ;;  %v930_v50 = vpop.xlane.xlu1 %929 }
 0x146   : > { %v870_v3 = vrot.slane %v667_v28, %v3269_v6  ;;  %v1042_v63 = vrot.slane %v930_v50, %v3190_v20 }
 0x148   : > { %v871_v21 = vsel %vm782_vm2, %v870_v3, %v866_v45  ;;  %1286 = vadd.xlane.f32.xlu0 %v1234_v54  ;;  %1270 = vadd.xlane.f32.xlu1 %v1226_v10 }
 0x149   : > { %v671_v27 = vpop.xlane.xlu0 %670  ;;  %v948_v9 = vpop.xlane.xlu1 %947  ;;  %v3380_v18 = vsel %vm918_vm4, %v871_v21, %v917_v42 }
 0x14a   : > { %v879_v59 = vrot.slane %v671_v27, %v3190_v20  ;;  %v1086_v44 = vrot.slane %v948_v9, %v3190_v20 }
 0x14c   : > { %v880_v13 = vsel %vm733_vm5, %v879_v59, %v875_v15  ;;  %1318 = vadd.xlane.f32.xlu0 %v1250_v32  ;;  %1304 = vadd.xlane.f32.xlu1 %v1243_v47 }
 0x14d   : > { %v928_v4 = vpop.xlane.xlu0 %927  ;;  %v950_v62 = vpop.xlane.xlu1 %949  ;;  %v3390_v36 = vsel %vm740_vm9, %v884_v30, %v880_v13 }
 0x14e   : > { %v1038_v42 = vrot.slane %v928_v4, %v3198_v29  ;;  %v1091_v23 = vrot.slane %v950_v62, %v3204_v2 }
 0x150   : > { %v1043_v49 = vsel %vm733_vm5, %v1042_v63, %v1038_v42  ;;  %997 = vadd.xlane.f32.xlu0 %v514_v14  ;;  %1306 = vadd.xlane.f32.xlu1 %v1244_v8 }
 0x151   : > { %v946_v57 = vpop.xlane.xlu0 %945  ;;  %v966_v56 = vpop.xlane.xlu1 %965 }
 0x152   : > { %v1082_v11 = vrot.slane %v946_v57, %v3198_v29  ;;  %v1130_v61 = vrot.slane %v966_v56, %v3190_v20 }
 0x154   : > { %v1087_v51 = vsel %vm733_vm5, %v1086_v44, %v1082_v11  ;;  %1288 = vadd.xlane.f32.xlu0 %v1235_v38  ;;  %1324 = vadd.xlane.f32.xlu1 %v1253_v37 }
 0x155   : > { %v1092_v16 = vsel %vm740_vm9, %v1091_v23, %v1087_v51  ;;  %v932_v39 = vpop.xlane.xlu0 %931  ;;  %v952_v35 = vpop.xlane.xlu1 %951 }
 0x156   : > { %v1047_v53 = vrot.slane %v932_v39, %v3204_v2  ;;  %v1096_v60 = vrot.slane %v952_v35, %v3212_v33 }
 0x158   : > { %v1048_v40 = vsel %vm740_vm9, %v1047_v53, %v1043_v49  ;;  %1320 = vadd.xlane.f32.xlu0 %v1251_v41  ;;  %v1097_v25 = vsel %vm747_vm10, %v1096_v60, %v1092_v16 }
 0x159   : > { %v964_v14 = vpop.xlane.xlu0 %963  ;;  %v982_v5 = vpop.xlane.xlu1 %981 }
 0x15a   : > { %v1126_v1 = vrot.slane %v964_v14, %v3198_v29  ;;  %v1170_v50 = vrot.slane %v982_v5, %v3198_v29 }
 0x15c   : > { %v1131_v34 = vsel %vm733_vm5, %v1130_v61, %v1126_v1  ;;  %1322 = vadd.xlane.f32.xlu0 %v1252_v58 }
 0x15d   : > { %v934_v52 = vpop.xlane.xlu0 %933  ;;  %v1255_v24 = vpop.xlane.xlu1 %1254 }
 0x15e   : > { %v1052_v0 = vrot.slane %v934_v52, %v3212_v33  ;;  %v1365_v32 = vrot.slane %v1255_v24, %v3198_v29 }
 0x160   : > { %v1053_v48 = vsel %vm747_vm10, %v1052_v0, %v1048_v40  ;;  %1625 = vadd.xlane.f32.xlu0 %v3298_v22 }
 0x161   : > { %v968_v19 = vpop.xlane.xlu0 %967  ;;  %v1273_v12 = vpop.xlane.xlu1 %1272 }
 0x162   : > { %v1135_v45 = vrot.slane %v968_v19, %v3204_v2  ;;  %v1409_v4 = vrot.slane %v1273_v12, %v3198_v29 }
 0x164   : > { %v1136_v46 = vsel %vm740_vm9, %v1135_v45, %v1131_v34 }
 0x165   : > { %v984_v28 = vpop.xlane.xlu0 %983  ;;  %v936_v54 = vpop.xlane.xlu1 %935 }
 0x166   : > { %v1174_v10 = vrot.slane %v984_v28, %v3190_v20  ;;  %v1057_v3 = vrot.slane %v936_v54, %v3222_v26 }
 0x168   : > { %v1175_v21 = vsel %vm733_vm5, %v1174_v10, %v1170_v50  ;;  %v1058_v30 = vsel %vm754_vm3, %v1057_v3, %v1053_v48 }
 0x169   : > { %v1257_v27 = vpop.xlane.xlu0 %1256  ;;  %v970_v22 = vpop.xlane.xlu1 %969 }
 0x16a   : > { %v1369_v9 = vrot.slane %v1257_v27, %v3190_v20  ;;  %v1140_v47 = vrot.slane %v970_v22, %v3212_v33 }
 0x16c   : > { %v1370_v15 = vsel %vm733_vm5, %v1369_v9, %v1365_v32  ;;  %v1141_v59 = vsel %vm747_vm10, %v1140_v47, %v1136_v46 }
 0x16d   : > { %v1275_v13 = vpop.xlane.xlu0 %1274  ;;  %v1259_v63 = vpop.xlane.xlu1 %1258 }
 0x16e   : > { %v1413_v62 = vrot.slane %v1275_v13, %v3190_v20  ;;  %v1374_v8 = vrot.slane %v1259_v63, %v3204_v2 }
 0x170   : > { %v1414_v42 = vsel %vm733_vm5, %v1413_v62, %v1409_v4  ;;  %v1375_v49 = vsel %vm740_vm9, %v1374_v8, %v1370_v15 }
 0x171   : > { %v954_v44 = vpop.xlane.xlu0 %953  ;;  %v1291_v57 = vpop.xlane.xlu1 %1290 }
 0x172   : > { %v1101_v38 = vrot.slane %v954_v44, %v3222_v26  ;;  %v1453_v58 = vrot.slane %v1291_v57, %v3198_v29 }
 0x174   : > { %v1102_v23 = vsel %vm754_vm3, %v1101_v38, %v1097_v25 }
 0x175   : > { %v986_v56 = vpop.xlane.xlu0 %985  ;;  %v675_v37 = vpop.xlane.xlu1 %674 }
 0x176   : > { %v1179_v11 = vrot.slane %v986_v56, %v3204_v2  ;;  %v889_v51 = vrot.slane %v675_v37, %v3212_v33 }
 0x178   : > { %v1180_v16 = vsel %vm740_vm9, %v1179_v11, %v1175_v21  ;;  %v890_v39 = vsel %vm747_vm10, %v889_v51, %v3390_v36 }
 0x179   : > { %v1277_v41 = vpop.xlane.xlu0 %1276  ;;  %v956_v35 = vpop.xlane.xlu1 %955 }
 0x17a   : > { %v1418_v53 = vrot.slane %v1277_v41, %v3204_v2  ;;  %v1106_v60 = vrot.slane %v956_v35, %v3231_v7 }
 0x17c   : > { %v1419_v40 = vsel %vm740_vm9, %v1418_v53, %v1414_v42  ;;  %v1107_v61 = vsel %vm761_vm7, %v1106_v60, %v1102_v23 }
 0x17d   : > { %v1293_v25 = vpop.xlane.xlu0 %1292  ;;  %v988_v14 = vpop.xlane.xlu1 %987 }
 0x17e   : > { %v1457_v5 = vrot.slane %v1293_v25, %v3190_v20  ;;  %v1184_v1 = vrot.slane %v988_v14, %v3212_v33 }
 0x180   : > { %v1458_v36 = vsel %vm733_vm5, %v1457_v5, %v1453_v58  ;;  %v1185_v34 = vsel %vm747_vm10, %v1184_v1, %v1180_v16 }
 0x181   : > { %v938_v52 = vpop.xlane.xlu0 %937  ;;  %v1279_v24 = vpop.xlane.xlu1 %1278 }
 0x182   : > { %v1062_v0 = vrot.slane %v938_v52, %v3231_v7  ;;  %v1423_v48 = vrot.slane %v1279_v24, %v3212_v33 }
 0x184   : > { %v1063_v19 = vsel %vm761_vm7, %v1062_v0, %v1058_v30  ;;  %v1424_v12 = vsel %vm747_vm10, %v1423_v48, %v1419_v40 }
 0x185   : > { %v972_v45 = vpop.xlane.xlu0 %971  ;;  %v1309_v46 = vpop.xlane.xlu1 %1308 }
 0x186   : > { %v1145_v28 = vrot.slane %v972_v45, %v3222_v26  ;;  %v1497_v4 = vrot.slane %v1309_v46, %v3198_v29 }
 0x188   : > { %v3460_v54 = vsel %vm754_vm3, %v1145_v28, %v1141_v59 }
 0x189   : > { %v1261_v50 = vpop.xlane.xlu0 %1260  ;;  %v677_v10 = vpop.xlane.xlu1 %676 }
 0x18a   : > { %v1379_v3 = vrot.slane %v1261_v50, %v3212_v33  ;;  %v894_v21 = vrot.slane %v677_v10, %v3222_v26 }
 0x18c   : > { %v1380_v27 = vsel %vm747_vm10, %v1379_v3, %v1375_v49  ;;  %v3466_v22 = vsel %vm754_vm3, %v894_v21, %v890_v39 }
 0x18d   : > { %v1295_v30 = vpop.xlane.xlu0 %1294  ;;  %v958_v32 = vpop.xlane.xlu1 %957 }
 0x18e   : > { %v1462_v9 = vrot.slane %v1295_v30, %v3204_v2  ;;  %v1111_v47 = vrot.slane %v958_v32, %v3243_v43 }
 0x190   : > { %v3471_v15 = vsel %vm740_vm9, %v1462_v9, %v1458_v36  ;;  %v1112_v59 = vsel %vm768_vm14, %v1111_v47, %v1107_v61 }
 0x191   : > { %v1311_v13 = vpop.xlane.xlu0 %1310  ;;  %v990_v63 = vpop.xlane.xlu1 %989 }
 0x192   : > { %v1501_v62 = vrot.slane %v1311_v13, %v3190_v20  ;;  %v1189_v8 = vrot.slane %v990_v63, %v3222_v26 }
 0x194   : > { %v1502_v42 = vsel %vm733_vm5, %v1501_v62, %v1497_v4  ;;  %v3479_v49 = vsel %vm754_vm3, %v1189_v8, %v1185_v34  ;;  %vm923_vm5 = vcmask 584704  }
 0x195   : > { %v940_v44 = vpop.xlane.xlu0 %939  ;;  %v1281_v57 = vpop.xlane.xlu1 %1280 }
 0x196   : > { %v1067_v38 = vrot.slane %v940_v44, %v3243_v43  ;;  %v1428_v23 = vrot.slane %v1281_v57, %v3222_v26 }
 0x198   : > { %v1068_v56 = vsel %vm768_vm14, %v1067_v38, %v1063_v19  ;;  %v3485_v37 = vsel %vm754_vm3, %v1428_v23, %v1424_v12 }
 0x199   : > { %v974_v29 = vpop.xlane.xlu0 %973  ;;  %v1313_v20 = vpop.xlane.xlu1 %1312 }
 0x19a   : > { %v1506_v11 = vrot.slane %v1313_v20, %v3204_v2  ;;  %v1150_v10 = vrot.slane %v974_v29, %v3231_v7 }
 0x19c   : > { %v3489_v51 = vsel %vm740_vm9, %v1506_v11, %v1502_v42  ;;  %v1151_v9 = vsel %vm761_vm7, %v1150_v10, %v3460_v54  ;;  %vm261_vm9 = vcmask 27648  }
 0x19d   : > { %v1263_v16 = vpop.xlane.xlu0 %1262  ;;  %v942_v39 = vpop.xlane.xlu1 %941  ;;  %262 = vst.msk [vmem:[%s248_s26] sm:$0xf] %vm261_vm9, %v2120_v17 }
 0x19e   : > { %v1384_v41 = vrot.slane %v1263_v16, %v3222_v26  ;;  %v1072_v0 = vrot.slane %v942_v39, %v3240_v55 }
 0x1a0   : > { %v3493_v35 = vsel %vm754_vm3, %v1384_v41, %v1380_v27  ;;  %v1073_v28 = vsel %vm775_vm15, %v1072_v0, %v1068_v56 }
 0x1a1   : > { %v3495_v53 = vpop.xlane.xlu0 %1296  ;;  %v976_v60 = vpop.xlane.xlu1 %975 }
 0x1a2   : > { %v1155_v30 = vrot.slane %v976_v60, %v3243_v43 }
 0x1a4   : > { %v1156_v13 = vsel %vm768_vm14, %v1155_v30, %v1151_v9 }
 0x1a5   : > { %v679_v40 = vpop.xlane.xlu0 %678  ;;  %v3497_v61 = vpop.xlane.xlu1 %1264 }
 0x1a6   : > { %v899_v57 = vrot.slane %v679_v40, %v3231_v7 }
 0x1a8   : > { %v900_v29 = vsel %vm761_vm7, %v899_v57, %v3466_v22  ;;  %v1467_v22 = vrot.slane %v3495_v53, %v3212_v33 }
 0x1a9   : > { %v960_v25 = vpop.xlane.xlu0 %959  ;;  %v3499_v14 = vpop.xlane.xlu1 %1298 }
 0x1aa   : > { %v1116_v36 = vrot.slane %v960_v25, %v3240_v55 }
 0x1ac   : > { %v1117_v48 = vsel %vm775_vm15, %v1116_v36, %v1112_v59 }
 0x1ad   : > { %v3501_v2 = vpop.xlane.xlu0 %991  ;;  %v681_v58 = vpop.xlane.xlu1 %680 }
 0x1ae   : > { %v904_v54 = vrot.slane %v681_v58, %v3243_v43  ;;  %v1194_v36 = vrot.slane %v3501_v2, %v3231_v7 }
 0x1b0   : > { %v905_v16 = vsel %vm768_vm14, %v904_v54, %v900_v29 }
 0x1b1   : > { %v3503_v5 = vpop.xlane.xlu0 %1282  ;;  %v962_v1 = vpop.xlane.xlu1 %961 }
 0x1b2   : > { %v1121_v24 = vrot.slane %v962_v1, %v3269_v6  ;;  %v1433_v53 = vrot.slane %v3503_v5, %v3231_v7 }
 0x1b4   : > { %v1122_v45 = vsel %vm782_vm2, %v1121_v24, %v1117_v48  ;;  %v1472_v24 = vrot.slane %v3499_v14, %v3222_v26  ;;  %v1195_v14 = vsel %vm761_vm7, %v1194_v36, %v3479_v49  ;;  %v1434_v9 = vsel %vm761_vm7, %v1433_v53, %v3485_v37 }
 0x1b5   : > { %v3506_v34 = vpop.xlane.xlu0 %1314  ;;  %v3508_v52 = vpop.xlane.xlu1 %993 }
 0x1b6   : > { %v1511_v29 = vrot.slane %v3506_v34, %v3212_v33 }
 0x1b8   : > { %v1512_v33 = vsel %vm747_vm10, %v1511_v29, %v3489_v51 }
 0x1b9   : > { %v944_v19 = vpop.xlane.xlu0 %943  ;;  %v3513_v12 = vpop.xlane.xlu1 %1284 }
 0x1ba   : > { %v1077_v46 = vrot.slane %v944_v19, %v3269_v6  ;;  %v1199_v19 = vrot.slane %v3508_v52, %v3243_v43  ;;  %v1438_v52 = vrot.slane %v3513_v12, %v3243_v43 }
 0x1bc   : > { %v1078_v50 = vsel %vm782_vm2, %v1077_v46, %v1073_v28  ;;  %v1389_v46 = vrot.slane %v3497_v61, %v3231_v7 }
 0x1bd   : > { %v978_v3 = vpop.xlane.xlu0 %977  ;;  %v3520_v21 = vpop.xlane.xlu1 %1316  ;;  %v1211_v27 = vsel %vm916_vm12, %v1122_v45, %v1078_v50 }
 0x1be   : > { %v1160_v32 = vrot.slane %v978_v3, %v3240_v55  ;;  %v1200_v3 = vsel %vm768_vm14, %v1199_v19, %v1195_v14 }
 0x1c0   : > { %v1161_v4 = vsel %vm775_vm15, %v1160_v32, %v1156_v13 }
 0x1c1   : > { %v3527_v47 = vpop.xlane.xlu0 %1266  ;;  %v980_v59 = vpop.xlane.xlu1 %979 }
 0x1c2   : > { %v1165_v63 = vrot.slane %v980_v59, %v3269_v6  ;;  %v1394_v61 = vrot.slane %v3527_v47, %v3243_v43 }
 0x1c4   : > { %v1166_v62 = vsel %vm782_vm2, %v1165_v63, %v1161_v4  ;;  %v1390_v63 = vsel %vm761_vm7, %v1389_v46, %v3493_v35  ;;  %v1439_v4 = vsel %vm768_vm14, %v1438_v52, %v1434_v9 }
 0x1c5   : > { %v1301_v8 = vpop.xlane.xlu0 %1300  ;;  %v1269_v42 = vpop.xlane.xlu1 %1268  ;;  %v1212_v44 = vsel %vm918_vm4, %v1166_v62, %v1211_v27  ;;  %v1395_v57 = vsel %vm768_vm14, %v1394_v61, %v1390_v63 }
 0x1c6   : > { %v1477_v2 = vrot.slane %v1301_v8, %v3231_v7  ;;  %v1399_v49 = vrot.slane %v1269_v42, %v3240_v55 }
 0x1c8   : > { %v1400_v54 = vsel %vm775_vm15, %v1399_v49, %v1395_v57 }
 0x1c9   : > { %v683_v38 = vpop.xlane.xlu0 %682  ;;  %v1303_v23 = vpop.xlane.xlu1 %1302 }
 0x1ca   : > { %v909_v56 = vrot.slane %v683_v38, %v3240_v55  ;;  %v1482_v50 = vrot.slane %v1303_v23, %v3243_v43 }
 0x1cc   : > { %v910_v41 = vsel %vm775_vm15, %v909_v56, %v905_v16 }
 0x1cd   : > { %v996_v20 = vpop.xlane.xlu0 %995  ;;  %v685_v11 = vpop.xlane.xlu1 %684 }
 0x1ce   : > { %v914_v39 = vrot.slane %v685_v11, %v3269_v6  ;;  %v1204_v45 = vrot.slane %v996_v20, %v3240_v55  ;;  %v1516_v11 = vrot.slane %v3520_v21, %v3222_v26 }
 0x1d0   : > { %v915_v60 = vsel %vm782_vm2, %v914_v39, %v910_v41  ;;  %v1205_v30 = vsel %vm775_vm15, %v1204_v45, %v1200_v3  ;;  %v1517_v34 = vsel %vm754_vm3, %v1516_v11, %v1512_v33 }
 0x1d1   : > { %v1287_v40 = vpop.xlane.xlu0 %1286  ;;  %v1271_v25 = vpop.xlane.xlu1 %1270  ;;  %v921_v58 = vsel %vm920_vm13, %v915_v60, %v3380_v18  ;;  %v1468_v18 = vsel %vm747_vm10, %v1467_v22, %v3471_v15  ;;  %vm1634_vm10 = vcmp.eq.s32.totalorder %v3179_v31, 0 }
 0x1d2   : > { %v924_v1 = vsel %vm923_vm5, %v921_v58, 0.0  ;;  %v1473_v28 = vsel %vm754_vm3, %v1472_v24, %v1468_v18  ;;  %v1443_v32 = vrot.slane %v1287_v40, %v3240_v55  ;;  %v1404_v13 = vrot.slane %v1271_v25, %v3269_v6 }
 0x1d3   : > { %925 = vadd.xlane.f32.xlu1 %v924_v1  ;;  %v1478_v59 = vsel %vm761_vm7, %v1477_v2, %v1473_v28  ;;  %vm1639_vm3 = vcmp.eq.s32.totalorder %v3179_v31, 2 }
 0x1d4   : > { %v1483_v62 = vsel %vm768_vm14, %v1482_v50, %v1478_v59  ;;  %v1444_v56 = vsel %vm775_vm15, %v1443_v32, %v1439_v4 }
 0x1d5   : > { %v1319_v0 = vpop.xlane.xlu0 %1318  ;;  %v1305_v48 = vpop.xlane.xlu1 %1304 }
 0x1d6   : > { %v1487_v27 = vrot.slane %v1305_v48, %v3240_v55  ;;  %v1521_v41 = vrot.slane %v1319_v0, %v3231_v7 }
 0x1d8   : > { %v1488_v37 = vsel %vm775_vm15, %v1487_v27, %v1483_v62  ;;  %v1522_v26 = vsel %vm761_vm7, %v1521_v41, %v1517_v34  ;;  %vm1642_vm7 = vcmp.eq.s32.totalorder %v3179_v31, 3 }
 0x1d9   : > { %v998_v10 = vpop.xlane.xlu0 %997  ;;  %v1307_v15 = vpop.xlane.xlu1 %1306 }
 0x1da   : > { %v1209_v5 = vrot.slane %v998_v10, %v3269_v6  ;;  %v1492_v12 = vrot.slane %v1307_v15, %v3269_v6  ;;  %v1646_v15 = vld [vmem:[%s248_s26] sm:$0xf] }
 0x1dc   : > { %v1210_v47 = vsel %vm782_vm2, %v1209_v5, %v1205_v30  ;;  %v1493_v35 = vsel %vm782_vm2, %v1492_v12, %v1488_v37 }
 0x1dd   : > { %v1289_v8 = vpop.xlane.xlu0 %1288  ;;  %v1213_v42 = vsel %vm920_vm13, %v1210_v47, %v1212_v44  ;;  %v1405_v44 = vsel %vm782_vm2, %v1404_v13, %v1400_v54  ;;  %v1325_v60 = vpop.xlane.xlu1 %1324 }
 0x1de   : > { %v1448_v38 = vrot.slane %v1289_v8, %v3269_v6  ;;  %v1215_v23 = vsel %vm923_vm5, %v1213_v42, 0.0  ;;  %v1536_v1 = vrot.slane %v1325_v60, %v3269_v6 }
 0x1df   : > { %1216 = vadd.xlane.f32.xlu0 %v1215_v23 }
 0x1e0   : > { %v1449_v20 = vsel %vm782_vm2, %v1448_v38, %v1444_v56 }
 0x1e1   : > { %v1321_v16 = vpop.xlane.xlu0 %1320  ;;  %v1538_v39 = vsel %vm916_vm12, %v1449_v20, %v1405_v44 }
 0x1e2   : > { %v1539_v40 = vsel %vm918_vm4, %v1493_v35, %v1538_v39  ;;  %v1526_v25 = vrot.slane %v1321_v16, %v3243_v43 }
 0x1e4   : > { %v1527_v7 = vsel %vm768_vm14, %v1526_v25, %v1522_v26 }
 0x1e5   : > { %v1323_v58 = vpop.xlane.xlu0 %1322 }
 0x1e6   : > { %v1531_v21 = vrot.slane %v1323_v58, %v3240_v55 }
 0x1e8   : > { %v1532_v22 = vsel %vm775_vm15, %v1531_v21, %v1527_v7 }
 0x1e9   : > { %v1537_v36 = vsel %vm782_vm2, %v1536_v1, %v1532_v22  ;;  %v1626_v24 = vpop.xlane.xlu0 %1625  ;;  %vm1636_vm2 = vcmp.eq.s32.totalorder %v3179_v31, 1 }
 0x1ea   : > { %v1540_v43 = vsel %vm920_vm13, %v1537_v36, %v1539_v40  ;;  %v1627_v0 = vrot.slane %v1626_v24, 4 }
 0x1eb   : > { %v1542_v51 = vsel %vm923_vm5, %v1540_v43, 0.0 }
 0x1ec   : > { %1543 = vadd.xlane.f32.xlu1 %v1542_v51  ;;  %v1628_v6 = vadd.f32 %v1627_v0, %v1626_v24 }
 0x1ee   : > { %v1629_v55 = vrot.slane %v1628_v6, 2 }
 0x1f0   : > { %v1630_v48 = vadd.f32 %v1629_v55, %v1628_v6 }
 0x1f2   : > { %v1631_v19 = vrot.slane %v1630_v48, 1 }
 0x1f4   : > { %v1632_v45 = vadd.f32 %v1631_v19, %v1630_v48 }
 0x1f6   : > { %1794 = vpush %v1632_v45 }
 0x227   : > { %s1795_s30 = spop %1794 }
 0x228   : > { %v1643_v17 = vstv %s1795_s30 }
 0x229   : > { %v1644_v10 = vsel %vm1642_vm7, %v1643_v17, 0.0 }
 0x25c   : > { %v926_v46 = vpop.xlane.xlu1 %925 }
 0x25d   : > { %v1635_v2 = vsel %vm1634_vm10, %v926_v46, 0.0 }
 0x268   : > { %v1217_v18 = vpop.xlane.xlu0 %1216 }
 0x269   : > { %v1637_v53 = vsel %vm1636_vm2, %v1217_v18, 0.0 }
 0x26a   : > { %v1638_v14 = vadd.f32 %v1637_v53, %v1635_v2 }
 0x275   : > { %v1544_v28 = vpop.xlane.xlu1 %1543 }
 0x276   : > { %v1640_v52 = vsel %vm1639_vm3, %v1544_v28, 0.0 }
 0x277   : > { %v1641_v50 = vadd.f32 %v1640_v52, %v1638_v14 }
 0x279   : > { %v1645_v3 = vadd.f32 %v1644_v10, %v1641_v50 }
 0x27b   : > { %v1647_v61 = vadd.f32 %v1646_v15, %v1645_v3 }
 0x27d   : > { %1649 = vst.msk [vmem:[%s248_s26] sm:$0xf] %vm261_vm9, %v1647_v61 }
 0x27e   : > { %2043 = shalt.err (!%p2040_p7)
}
 0x27f   : > { %s2044_s27 = scalar_lea.hbm %s1663_s16, 64  ;;  %s2048_s28 = scalar_lea.hbm %s3665_s2, 128 }
 0x280   : > { %p2045_p1 = scmp.ne.s32.totalorder %s1663_s16, %s2044_s27  ;;  %p2049_p3 = scmp.lt.s32.totalorder %s1663_s16, %s3665_s2 }
 0x281   : > { %p2050_p8 = scmp.lt.s32.totalorder %s2048_s28, %s2044_s27 }
 0x282   : > { %p2046_p10 = pnand %p2045_p1, %p2188_p9 }
 0x283   : > { %p2051_p0 = por %p2050_p8, %p2049_p3 }
 0x284   : > { %p2047_p13 = pneg %p2046_p10 }
 0x286   : > { %p2052_p12 = pnand %p2051_p0, %p2047_p13 }
 0x288   : > { %2055 = shalt.err (!%p2052_p12)
}
 0x289   : > { %1800 = dma.vmem_to_hbm [thread:$0]  (%p2188_p9), %s1666_s7, 64, %s1663_s16, %s1651_s3  }
 0x28a PF: > { %s1677_s21 = sand.u32 1, %s2094_s9   ;;  %p3839_p2 = scmp.ge.s32.totalorder %s2114_s14, 2 }
 0x28b   : > { %s1678_s26 = scalar_lea.sflag [#allocation4], %s1677_s21 }
 0x28c   : > { %p1810_p4 = pnand %p3839_p2, %p2195_p11 }
 0x28e   : > { %p1811_p5 = pneg %p1810_p4 }
 0x290   : > { %2089 = dma.done.wait (%p1811_p5), %s1678_s26, 64  }
 0x291   : > { %2091 = vsyncadd (%p1811_p5), %s1678_s26, 4294967232  ;;  %s21_s14 = sadd.s32 1, %s2114_s14   ;;  %s3840_s9 = smov %s2098_s10 }
 0x292   : > { %p18_p6 = scmp.ge.s32.totalorder %s21_s14, 4   ;;  %s3841_s10 = smov %s2102_s11 }
 0x293   : > { %s3842_s11 = smov %s2193_s23  ;;  %s3843_s12 = smov %s2110_s13 }
 0x294   : > { %s3844_s13 = smov %s3846_s17  ;;  %20 = sbr.rel (!%p18_p6) target bundleno = 8 (0x8), region = 90 }
 0x299   :  { %1683 = vsyncpa [#allocation3], 1 }
 0x29a   :  { %1685 = vsyncpa [#allocation3 + $0x1], 1 }
 0x29b   :  { %1686 = vsyncpa [#allocation6], 1 }
 0x29c   :  { %1688 = vsyncpa [#allocation6 + $0x1], 1 }
 0x29d   :  { %1689 = vsyncpa [#allocation4], 1 }
 0x29e   :  { %1691 = vsyncpa [#allocation4 + $0x1], 1 }

</bundles_post_ra>
